<compile_context>
chip_gen: v5e
topology: v5e:2x2
jax: 0.10.0
libtpu: 0.0.40
codegen_flags: <defaults>
</compile_context>

<pallas_src>
import functools

import jax
import jax.numpy as jnp
from jax import lax
from jax.experimental import pallas as pl
from jax.experimental.pallas import tpu as pltpu


# ---------------------------------------------------------------------------
# Kernel: whole batch in one invocation, operating on (rows, N*H*W) slabs.
#   ext = relu(BN(1x1)) -> relu(BN(3x3, pad=1)) -> relu(BN(1x1))
#   out = relu(ext + x)      (Dropout2d p=0 / eval mode == identity)
# ---------------------------------------------------------------------------
def _bottleneck_kernel(w1_ref, b1_ref, w2_ref, b2_ref, w3_ref, b3_ref,
                       x_ref, out_ref, *, C, Ci, H, W, N):
    HW = H * W
    NHW = N * HW
    x = x_ref[...]                                   # (C, N*HW), lane-dense

    # ---- ext_conv1: 1x1 conv + folded BN + ReLU --------------------------
    # C rank-1 FMAs: (Ci,1) weight column x (1,NHW) input row -> (Ci,NHW).
    acc1 = w1_ref[:, 0:1] * x[0:1, :]
    for c in range(1, C):
        acc1 = acc1 + w1_ref[:, c:c + 1] * x[c:c + 1, :]
    t1 = jnp.maximum(acc1 + b1_ref[...], 0.0)        # (Ci, NHW)

    # ---- ext_conv2: 3x3 SAME conv + folded BN + ReLU ----------------------
    # One XLU roll + one boundary select per tap offset (shared across all
    # internal channels and all images), then Ci rank-1 FMAs per offset.
    p = lax.broadcasted_iota(jnp.int32, (1, NHW), 1)
    if HW & (HW - 1) == 0:
        q = jnp.bitwise_and(p, HW - 1)               # position within image
    else:
        q = p % HW
    if W & (W - 1) == 0:
        col = jnp.bitwise_and(p, W - 1)              # column within image
    else:
        col = p % W

    offs = [(dh, dw) for dh in (-1, 0, 1) for dw in (-1, 0, 1)]
    acc2 = None
    for k, (dh, dw) in enumerate(offs):
        s = dh * W + dw
        if s == 0:
            tap = t1                                 # center tap, no mask
        else:
            rolled = pltpu.roll(t1, (-s) % NHW, axis=1)
            mask = ((q >= -dh * W) & (q < HW - dh * W) &
                    (col >= -dw) & (col < W - dw))   # (1, NHW)
            tap = jnp.where(mask, rolled, 0.0)       # (Ci, NHW)
        for ci in range(Ci):
            widx = ci * 9 + k
            term = w2_ref[:, widx:widx + 1] * tap[ci:ci + 1, :]
            acc2 = term if acc2 is None else acc2 + term
    t2 = jnp.maximum(acc2 + b2_ref[...], 0.0)        # (Ci, NHW)

    # ---- ext_conv3: 1x1 conv + folded BN + ReLU ---------------------------
    # Ci rank-1 FMAs building the full (C, NHW) slab directly.
    acc3 = w3_ref[:, 0:1] * t2[0:1, :]
    for ci in range(1, Ci):
        acc3 = acc3 + w3_ref[:, ci:ci + 1] * t2[ci:ci + 1, :]
    t3 = jnp.maximum(acc3 + b3_ref[...], 0.0)        # (C, NHW)

    # ---- ext_regularizer (identity) + residual + output ReLU --------------
    out_ref[...] = jnp.maximum(t3 + x, 0.0).astype(out_ref.dtype)


# ---------------------------------------------------------------------------
# Wrapper: NCHW in/out; (C, N*H*W) lane-flattened inside the kernel.
# ---------------------------------------------------------------------------
def regular_bottleneck(x_nchw, w1, b1, w2, b2, w3, b3):
    N, C, H, W = x_nchw.shape
    Ci = w1.shape[0]
    HW = H * W
    NHW = N * HW

    # Lane-flatten batch + spatial: (N,C,H,W) -> (C, N*H*W).  Wrapper-side
    # layout plumbing so every in-kernel op/store is lane-dense.
    x_cn = jnp.transpose(x_nchw.reshape(N, C, HW), (1, 0, 2)).reshape(C, NHW)

    kernel = functools.partial(_bottleneck_kernel, C=C, Ci=Ci, H=H, W=W, N=N)
    vmem = lambda: pl.BlockSpec(memory_space=pltpu.MemorySpace.VMEM)

    out = pl.pallas_call(
        kernel,
        out_shape=jax.ShapeDtypeStruct((C, NHW), x_nchw.dtype),
        in_specs=[vmem() for _ in range(7)],
        out_specs=vmem(),
    )(w1, b1, w2, b2, w3, b3, x_cn)

    return jnp.transpose(out.reshape(C, N, HW), (1, 0, 2)).reshape(N, C, H, W)


# ---------------------------------------------------------------------------
# Deterministic parameter construction + eval-mode BN folding.
# PyTorch conv weight shapes: conv1 (Ci,C,1,1), conv2 (Ci,Ci,3,3), conv3 (C,Ci,1,1).
# Kernel-facing layouts: w1 (Ci,C), w2 (Ci, Ci*9) [col = ci_in*9 + kh*3 + kw],
#                        w3 (C,Ci), biases as (rows,1) columns.
# ---------------------------------------------------------------------------
def make_params(key, channels, internal_ratio=4, eps=1e-5):
    Ci = channels // internal_ratio
    ks = jax.random.split(key, 6)

    def bn_fold(k, n):
        k1, k2, k3, k4 = jax.random.split(k, 4)
        gamma = 1.0 + 0.1 * jax.random.normal(k1, (n,), jnp.float32)
        beta = 0.1 * jax.random.normal(k2, (n,), jnp.float32)
        mean = 0.1 * jax.random.normal(k3, (n,), jnp.float32)
        var = jnp.abs(0.5 + 0.1 * jax.random.normal(k4, (n,), jnp.float32))
        s = gamma / jnp.sqrt(var + eps)
        return s, beta - mean * s

    # conv1 + BN(Ci)
    w1_t = 0.1 * jax.random.normal(ks[0], (Ci, channels, 1, 1), jnp.float32)
    s1, b1 = bn_fold(ks[1], Ci)
    w1 = w1_t[:, :, 0, 0] * s1[:, None]                         # (Ci, C)

    # conv2 + BN(Ci)
    w2_t = 0.1 * jax.random.normal(ks[2], (Ci, Ci, 3, 3), jnp.float32)
    s2, b2 = bn_fold(ks[3], Ci)
    w2f = w2_t * s2[:, None, None, None]                        # (O, I, 3, 3)
    w2 = jnp.transpose(w2f, (1, 2, 3, 0)).reshape(Ci * 9, Ci).T  # (O, I*9)

    # conv3 + BN(C)
    w3_t = 0.1 * jax.random.normal(ks[4], (channels, Ci, 1, 1), jnp.float32)
    s3, b3 = bn_fold(ks[5], channels)
    w3 = w3_t[:, :, 0, 0] * s3[:, None]                         # (C, Ci)

    return w1, b1[:, None], w2, b2[:, None], w3, b3[:, None]


# Pure-JAX reference (NCHW) for the correctness check.
def reference_nchw(x, w1, b1, w2, b2, w3, b3):
    N, C, H, W = x.shape
    Ci = w1.shape[0]
    w2_oihw = w2.reshape(Ci, Ci, 3, 3)
    t1 = jax.nn.relu(jnp.einsum('nchw,oc->nohw', x, w1)
                     + b1.reshape(1, Ci, 1, 1))
    t2 = jax.nn.relu(
        lax.conv_general_dilated(t1, w2_oihw, (1, 1), 'SAME',
                                 dimension_numbers=('NCHW', 'OIHW', 'NCHW'))
        + b2.reshape(1, Ci, 1, 1))
    t3 = jax.nn.relu(jnp.einsum('nchw,oc->nohw', t2, w3)
                     + b3.reshape(1, C, 1, 1))
    return jax.nn.relu(t3 + x)


if __name__ == "__main__":
    key = jax.random.PRNGKey(0)
    kx, kp = jax.random.split(key)

    # channels=8, internal_ratio=4 -> internal_channels=2
    # (module asserts 1 < internal_ratio < channels).
    N, C, H, W = 2, 8, 16, 16
    x = jax.random.normal(kx, (N, C, H, W), jnp.float32)        # PyTorch NCHW

    params = make_params(kp, C, internal_ratio=4)

    out = regular_bottleneck(x, *params)
    out = jax.block_until_ready(out)

    ref = reference_nchw(x, *params)
    assert out.shape == (N, C, H, W)
    err = float(jnp.max(jnp.abs(out - ref)))
    assert jnp.allclose(out, ref, atol=1e-4, rtol=1e-4), err
    print("KERNEL_OK")
</pallas_src>

<mosaic_0001>
module attributes {stable_mosaic.version = 11 : i64} {
  func.func @_bottleneck_kernel(%arg0: memref<2x8xf32, #tpu.memory_space<vmem>>, %arg1: memref<2x1xf32, #tpu.memory_space<vmem>>, %arg2: memref<2x18xf32, #tpu.memory_space<vmem>>, %arg3: memref<2x1xf32, #tpu.memory_space<vmem>>, %arg4: memref<8x2xf32, #tpu.memory_space<vmem>>, %arg5: memref<8x1xf32, #tpu.memory_space<vmem>>, %arg6: memref<8x512xf32, #tpu.memory_space<vmem>>, %arg7: memref<8x512xf32, #tpu.memory_space<vmem>>) attributes {dimension_semantics = [], scalar_prefetch = 0 : i64, scratch_operands = 0 : i64, tpu.core_type = #tpu.core_type<tc>} {
    %c0 = arith.constant 0 : index
    %c0_0 = arith.constant 0 : index
    %0 = vector.load %arg6[%c0, %c0_0] : memref<8x512xf32, #tpu.memory_space<vmem>>, vector<8x512xf32>
    %c0_1 = arith.constant 0 : index
    %c0_2 = arith.constant 0 : index
    %1 = vector.load %arg0[%c0_1, %c0_2] : memref<2x8xf32, #tpu.memory_space<vmem>>, vector<2x1xf32>
    %2 = vector.extract_strided_slice %0 {offsets = [0, 0], sizes = [1, 512], strides = [1, 1]} : vector<8x512xf32> to vector<1x512xf32>
    %3 = vector.broadcast %1 : vector<2x1xf32> to vector<2x512xf32>
    %4 = vector.broadcast %2 : vector<1x512xf32> to vector<2x512xf32>
    %5 = arith.mulf %3, %4 : vector<2x512xf32>
    %c0_3 = arith.constant 0 : index
    %c1 = arith.constant 1 : index
    %6 = vector.load %arg0[%c0_3, %c1] : memref<2x8xf32, #tpu.memory_space<vmem>>, vector<2x1xf32>
    %7 = vector.extract_strided_slice %0 {offsets = [1, 0], sizes = [1, 512], strides = [1, 1]} : vector<8x512xf32> to vector<1x512xf32>
    %8 = vector.broadcast %6 : vector<2x1xf32> to vector<2x512xf32>
    %9 = vector.broadcast %7 : vector<1x512xf32> to vector<2x512xf32>
    %10 = arith.mulf %8, %9 : vector<2x512xf32>
    %11 = arith.addf %5, %10 : vector<2x512xf32>
    %c0_4 = arith.constant 0 : index
    %c2 = arith.constant 2 : index
    %12 = vector.load %arg0[%c0_4, %c2] : memref<2x8xf32, #tpu.memory_space<vmem>>, vector<2x1xf32>
    %13 = vector.extract_strided_slice %0 {offsets = [2, 0], sizes = [1, 512], strides = [1, 1]} : vector<8x512xf32> to vector<1x512xf32>
    %14 = vector.broadcast %12 : vector<2x1xf32> to vector<2x512xf32>
    %15 = vector.broadcast %13 : vector<1x512xf32> to vector<2x512xf32>
    %16 = arith.mulf %14, %15 : vector<2x512xf32>
    %17 = arith.addf %11, %16 : vector<2x512xf32>
    %c0_5 = arith.constant 0 : index
    %c3 = arith.constant 3 : index
    %18 = vector.load %arg0[%c0_5, %c3] : memref<2x8xf32, #tpu.memory_space<vmem>>, vector<2x1xf32>
    %19 = vector.extract_strided_slice %0 {offsets = [3, 0], sizes = [1, 512], strides = [1, 1]} : vector<8x512xf32> to vector<1x512xf32>
    %20 = vector.broadcast %18 : vector<2x1xf32> to vector<2x512xf32>
    %21 = vector.broadcast %19 : vector<1x512xf32> to vector<2x512xf32>
    %22 = arith.mulf %20, %21 : vector<2x512xf32>
    %23 = arith.addf %17, %22 : vector<2x512xf32>
    %c0_6 = arith.constant 0 : index
    %c4 = arith.constant 4 : index
    %24 = vector.load %arg0[%c0_6, %c4] : memref<2x8xf32, #tpu.memory_space<vmem>>, vector<2x1xf32>
    %25 = vector.extract_strided_slice %0 {offsets = [4, 0], sizes = [1, 512], strides = [1, 1]} : vector<8x512xf32> to vector<1x512xf32>
    %26 = vector.broadcast %24 : vector<2x1xf32> to vector<2x512xf32>
    %27 = vector.broadcast %25 : vector<1x512xf32> to vector<2x512xf32>
    %28 = arith.mulf %26, %27 : vector<2x512xf32>
    %29 = arith.addf %23, %28 : vector<2x512xf32>
    %c0_7 = arith.constant 0 : index
    %c5 = arith.constant 5 : index
    %30 = vector.load %arg0[%c0_7, %c5] : memref<2x8xf32, #tpu.memory_space<vmem>>, vector<2x1xf32>
    %31 = vector.extract_strided_slice %0 {offsets = [5, 0], sizes = [1, 512], strides = [1, 1]} : vector<8x512xf32> to vector<1x512xf32>
    %32 = vector.broadcast %30 : vector<2x1xf32> to vector<2x512xf32>
    %33 = vector.broadcast %31 : vector<1x512xf32> to vector<2x512xf32>
    %34 = arith.mulf %32, %33 : vector<2x512xf32>
    %35 = arith.addf %29, %34 : vector<2x512xf32>
    %c0_8 = arith.constant 0 : index
    %c6 = arith.constant 6 : index
    %36 = vector.load %arg0[%c0_8, %c6] : memref<2x8xf32, #tpu.memory_space<vmem>>, vector<2x1xf32>
    %37 = vector.extract_strided_slice %0 {offsets = [6, 0], sizes = [1, 512], strides = [1, 1]} : vector<8x512xf32> to vector<1x512xf32>
    %38 = vector.broadcast %36 : vector<2x1xf32> to vector<2x512xf32>
    %39 = vector.broadcast %37 : vector<1x512xf32> to vector<2x512xf32>
    %40 = arith.mulf %38, %39 : vector<2x512xf32>
    %41 = arith.addf %35, %40 : vector<2x512xf32>
    %c0_9 = arith.constant 0 : index
    %c7 = arith.constant 7 : index
    %42 = vector.load %arg0[%c0_9, %c7] : memref<2x8xf32, #tpu.memory_space<vmem>>, vector<2x1xf32>
    %43 = vector.extract_strided_slice %0 {offsets = [7, 0], sizes = [1, 512], strides = [1, 1]} : vector<8x512xf32> to vector<1x512xf32>
    %44 = vector.broadcast %42 : vector<2x1xf32> to vector<2x512xf32>
    %45 = vector.broadcast %43 : vector<1x512xf32> to vector<2x512xf32>
    %46 = arith.mulf %44, %45 : vector<2x512xf32>
    %47 = arith.addf %41, %46 : vector<2x512xf32>
    %c0_10 = arith.constant 0 : index
    %c0_11 = arith.constant 0 : index
    %48 = vector.load %arg1[%c0_10, %c0_11] : memref<2x1xf32, #tpu.memory_space<vmem>>, vector<2x1xf32>
    %49 = vector.broadcast %48 : vector<2x1xf32> to vector<2x512xf32>
    %50 = arith.addf %47, %49 : vector<2x512xf32>
    %cst = arith.constant 0.000000e+00 : f32
    %51 = vector.broadcast %cst : f32 to vector<2x512xf32>
    %52 = arith.maximumf %50, %51 : vector<2x512xf32>
    %53 = tpu.iota {dimensions = array<i32: 1>} : vector<1x512xi32>
    %c255_i32 = arith.constant 255 : i32
    %54 = vector.broadcast %c255_i32 : i32 to vector<1x512xi32>
    %55 = arith.andi %53, %54 : vector<1x512xi32>
    %c15_i32 = arith.constant 15 : i32
    %56 = vector.broadcast %c15_i32 : i32 to vector<1x512xi32>
    %57 = arith.andi %53, %56 : vector<1x512xi32>
    %c17_i32 = arith.constant 17 : i32
    %58 = tpu.dynamic_rotate %52 by %c17_i32 dim 1 : vector<2x512xf32>, i32 -> vector<2x512xf32>
    %c16_i32 = arith.constant 16 : i32
    %59 = vector.broadcast %c16_i32 : i32 to vector<1x512xi32>
    %60 = arith.cmpi sge, %55, %59 : vector<1x512xi32>
    %c272_i32 = arith.constant 272 : i32
    %61 = vector.broadcast %c272_i32 : i32 to vector<1x512xi32>
    %62 = arith.cmpi slt, %55, %61 : vector<1x512xi32>
    %63 = arith.andi %60, %62 : vector<1x512xi1>
    %c1_i32 = arith.constant 1 : i32
    %64 = vector.broadcast %c1_i32 : i32 to vector<1x512xi32>
    %65 = arith.cmpi sge, %57, %64 : vector<1x512xi32>
    %66 = arith.andi %63, %65 : vector<1x512xi1>
    %c17_i32_12 = arith.constant 17 : i32
    %67 = vector.broadcast %c17_i32_12 : i32 to vector<1x512xi32>
    %68 = arith.cmpi slt, %57, %67 : vector<1x512xi32>
    %69 = arith.andi %66, %68 : vector<1x512xi1>
    %cst_13 = arith.constant 0.000000e+00 : f32
    %70 = vector.shape_cast %69 : vector<1x512xi1> to vector<1x512xi1>
    %71 = vector.broadcast %70 : vector<1x512xi1> to vector<2x512xi1>
    %72 = vector.broadcast %cst_13 : f32 to vector<2x512xf32>
    %73 = arith.select %71, %58, %72 : vector<2x512xi1>, vector<2x512xf32>
    %c0_14 = arith.constant 0 : index
    %c0_15 = arith.constant 0 : index
    %74 = vector.load %arg2[%c0_14, %c0_15] : memref<2x18xf32, #tpu.memory_space<vmem>>, vector<2x1xf32>
    %75 = vector.extract_strided_slice %73 {offsets = [0, 0], sizes = [1, 512], strides = [1, 1]} : vector<2x512xf32> to vector<1x512xf32>
    %76 = vector.broadcast %74 : vector<2x1xf32> to vector<2x512xf32>
    %77 = vector.broadcast %75 : vector<1x512xf32> to vector<2x512xf32>
    %78 = arith.mulf %76, %77 : vector<2x512xf32>
    %c0_16 = arith.constant 0 : index
    %c9 = arith.constant 9 : index
    %79 = vector.load %arg2[%c0_16, %c9] : memref<2x18xf32, #tpu.memory_space<vmem>>, vector<2x1xf32>
    %80 = vector.extract_strided_slice %73 {offsets = [1, 0], sizes = [1, 512], strides = [1, 1]} : vector<2x512xf32> to vector<1x512xf32>
    %81 = vector.broadcast %79 : vector<2x1xf32> to vector<2x512xf32>
    %82 = vector.broadcast %80 : vector<1x512xf32> to vector<2x512xf32>
    %83 = arith.mulf %81, %82 : vector<2x512xf32>
    %84 = arith.addf %78, %83 : vector<2x512xf32>
    %c16_i32_17 = arith.constant 16 : i32
    %85 = tpu.dynamic_rotate %52 by %c16_i32_17 dim 1 : vector<2x512xf32>, i32 -> vector<2x512xf32>
    %c16_i32_18 = arith.constant 16 : i32
    %86 = vector.broadcast %c16_i32_18 : i32 to vector<1x512xi32>
    %87 = arith.cmpi sge, %55, %86 : vector<1x512xi32>
    %c272_i32_19 = arith.constant 272 : i32
    %88 = vector.broadcast %c272_i32_19 : i32 to vector<1x512xi32>
    %89 = arith.cmpi slt, %55, %88 : vector<1x512xi32>
    %90 = arith.andi %87, %89 : vector<1x512xi1>
    %c0_i32 = arith.constant 0 : i32
    %91 = vector.broadcast %c0_i32 : i32 to vector<1x512xi32>
    %92 = arith.cmpi sge, %57, %91 : vector<1x512xi32>
    %93 = arith.andi %90, %92 : vector<1x512xi1>
    %c16_i32_20 = arith.constant 16 : i32
    %94 = vector.broadcast %c16_i32_20 : i32 to vector<1x512xi32>
    %95 = arith.cmpi slt, %57, %94 : vector<1x512xi32>
    %96 = arith.andi %93, %95 : vector<1x512xi1>
    %cst_21 = arith.constant 0.000000e+00 : f32
    %97 = vector.shape_cast %96 : vector<1x512xi1> to vector<1x512xi1>
    %98 = vector.broadcast %97 : vector<1x512xi1> to vector<2x512xi1>
    %99 = vector.broadcast %cst_21 : f32 to vector<2x512xf32>
    %100 = arith.select %98, %85, %99 : vector<2x512xi1>, vector<2x512xf32>
    %c0_22 = arith.constant 0 : index
    %c1_23 = arith.constant 1 : index
    %101 = vector.load %arg2[%c0_22, %c1_23] : memref<2x18xf32, #tpu.memory_space<vmem>>, vector<2x1xf32>
    %102 = vector.extract_strided_slice %100 {offsets = [0, 0], sizes = [1, 512], strides = [1, 1]} : vector<2x512xf32> to vector<1x512xf32>
    %103 = vector.broadcast %101 : vector<2x1xf32> to vector<2x512xf32>
    %104 = vector.broadcast %102 : vector<1x512xf32> to vector<2x512xf32>
    %105 = arith.mulf %103, %104 : vector<2x512xf32>
    %106 = arith.addf %84, %105 : vector<2x512xf32>
    %c0_24 = arith.constant 0 : index
    %c10 = arith.constant 10 : index
    %107 = vector.load %arg2[%c0_24, %c10] : memref<2x18xf32, #tpu.memory_space<vmem>>, vector<2x1xf32>
    %108 = vector.extract_strided_slice %100 {offsets = [1, 0], sizes = [1, 512], strides = [1, 1]} : vector<2x512xf32> to vector<1x512xf32>
    %109 = vector.broadcast %107 : vector<2x1xf32> to vector<2x512xf32>
    %110 = vector.broadcast %108 : vector<1x512xf32> to vector<2x512xf32>
    %111 = arith.mulf %109, %110 : vector<2x512xf32>
    %112 = arith.addf %106, %111 : vector<2x512xf32>
    %c15_i32_25 = arith.constant 15 : i32
    %113 = tpu.dynamic_rotate %52 by %c15_i32_25 dim 1 : vector<2x512xf32>, i32 -> vector<2x512xf32>
    %c16_i32_26 = arith.constant 16 : i32
    %114 = vector.broadcast %c16_i32_26 : i32 to vector<1x512xi32>
    %115 = arith.cmpi sge, %55, %114 : vector<1x512xi32>
    %c272_i32_27 = arith.constant 272 : i32
    %116 = vector.broadcast %c272_i32_27 : i32 to vector<1x512xi32>
    %117 = arith.cmpi slt, %55, %116 : vector<1x512xi32>
    %118 = arith.andi %115, %117 : vector<1x512xi1>
    %c-1_i32 = arith.constant -1 : i32
    %119 = vector.broadcast %c-1_i32 : i32 to vector<1x512xi32>
    %120 = arith.cmpi sge, %57, %119 : vector<1x512xi32>
    %121 = arith.andi %118, %120 : vector<1x512xi1>
    %c15_i32_28 = arith.constant 15 : i32
    %122 = vector.broadcast %c15_i32_28 : i32 to vector<1x512xi32>
    %123 = arith.cmpi slt, %57, %122 : vector<1x512xi32>
    %124 = arith.andi %121, %123 : vector<1x512xi1>
    %cst_29 = arith.constant 0.000000e+00 : f32
    %125 = vector.shape_cast %124 : vector<1x512xi1> to vector<1x512xi1>
    %126 = vector.broadcast %125 : vector<1x512xi1> to vector<2x512xi1>
    %127 = vector.broadcast %cst_29 : f32 to vector<2x512xf32>
    %128 = arith.select %126, %113, %127 : vector<2x512xi1>, vector<2x512xf32>
    %c0_30 = arith.constant 0 : index
    %c2_31 = arith.constant 2 : index
    %129 = vector.load %arg2[%c0_30, %c2_31] : memref<2x18xf32, #tpu.memory_space<vmem>>, vector<2x1xf32>
    %130 = vector.extract_strided_slice %128 {offsets = [0, 0], sizes = [1, 512], strides = [1, 1]} : vector<2x512xf32> to vector<1x512xf32>
    %131 = vector.broadcast %129 : vector<2x1xf32> to vector<2x512xf32>
    %132 = vector.broadcast %130 : vector<1x512xf32> to vector<2x512xf32>
    %133 = arith.mulf %131, %132 : vector<2x512xf32>
    %134 = arith.addf %112, %133 : vector<2x512xf32>
    %c0_32 = arith.constant 0 : index
    %c11 = arith.constant 11 : index
    %135 = vector.load %arg2[%c0_32, %c11] : memref<2x18xf32, #tpu.memory_space<vmem>>, vector<2x1xf32>
    %136 = vector.extract_strided_slice %128 {offsets = [1, 0], sizes = [1, 512], strides = [1, 1]} : vector<2x512xf32> to vector<1x512xf32>
    %137 = vector.broadcast %135 : vector<2x1xf32> to vector<2x512xf32>
    %138 = vector.broadcast %136 : vector<1x512xf32> to vector<2x512xf32>
    %139 = arith.mulf %137, %138 : vector<2x512xf32>
    %140 = arith.addf %134, %139 : vector<2x512xf32>
    %c1_i32_33 = arith.constant 1 : i32
    %141 = tpu.dynamic_rotate %52 by %c1_i32_33 dim 1 : vector<2x512xf32>, i32 -> vector<2x512xf32>
    %c0_i32_34 = arith.constant 0 : i32
    %142 = vector.broadcast %c0_i32_34 : i32 to vector<1x512xi32>
    %143 = arith.cmpi sge, %55, %142 : vector<1x512xi32>
    %c256_i32 = arith.constant 256 : i32
    %144 = vector.broadcast %c256_i32 : i32 to vector<1x512xi32>
    %145 = arith.cmpi slt, %55, %144 : vector<1x512xi32>
    %146 = arith.andi %143, %145 : vector<1x512xi1>
    %c1_i32_35 = arith.constant 1 : i32
    %147 = vector.broadcast %c1_i32_35 : i32 to vector<1x512xi32>
    %148 = arith.cmpi sge, %57, %147 : vector<1x512xi32>
    %149 = arith.andi %146, %148 : vector<1x512xi1>
    %c17_i32_36 = arith.constant 17 : i32
    %150 = vector.broadcast %c17_i32_36 : i32 to vector<1x512xi32>
    %151 = arith.cmpi slt, %57, %150 : vector<1x512xi32>
    %152 = arith.andi %149, %151 : vector<1x512xi1>
    %cst_37 = arith.constant 0.000000e+00 : f32
    %153 = vector.shape_cast %152 : vector<1x512xi1> to vector<1x512xi1>
    %154 = vector.broadcast %153 : vector<1x512xi1> to vector<2x512xi1>
    %155 = vector.broadcast %cst_37 : f32 to vector<2x512xf32>
    %156 = arith.select %154, %141, %155 : vector<2x512xi1>, vector<2x512xf32>
    %c0_38 = arith.constant 0 : index
    %c3_39 = arith.constant 3 : index
    %157 = vector.load %arg2[%c0_38, %c3_39] : memref<2x18xf32, #tpu.memory_space<vmem>>, vector<2x1xf32>
    %158 = vector.extract_strided_slice %156 {offsets = [0, 0], sizes = [1, 512], strides = [1, 1]} : vector<2x512xf32> to vector<1x512xf32>
    %159 = vector.broadcast %157 : vector<2x1xf32> to vector<2x512xf32>
    %160 = vector.broadcast %158 : vector<1x512xf32> to vector<2x512xf32>
    %161 = arith.mulf %159, %160 : vector<2x512xf32>
    %162 = arith.addf %140, %161 : vector<2x512xf32>
    %c0_40 = arith.constant 0 : index
    %c12 = arith.constant 12 : index
    %163 = vector.load %arg2[%c0_40, %c12] : memref<2x18xf32, #tpu.memory_space<vmem>>, vector<2x1xf32>
    %164 = vector.extract_strided_slice %156 {offsets = [1, 0], sizes = [1, 512], strides = [1, 1]} : vector<2x512xf32> to vector<1x512xf32>
    %165 = vector.broadcast %163 : vector<2x1xf32> to vector<2x512xf32>
    %166 = vector.broadcast %164 : vector<1x512xf32> to vector<2x512xf32>
    %167 = arith.mulf %165, %166 : vector<2x512xf32>
    %168 = arith.addf %162, %167 : vector<2x512xf32>
    %c0_41 = arith.constant 0 : index
    %c4_42 = arith.constant 4 : index
    %169 = vector.load %arg2[%c0_41, %c4_42] : memref<2x18xf32, #tpu.memory_space<vmem>>, vector<2x1xf32>
    %170 = vector.extract_strided_slice %52 {offsets = [0, 0], sizes = [1, 512], strides = [1, 1]} : vector<2x512xf32> to vector<1x512xf32>
    %171 = vector.broadcast %169 : vector<2x1xf32> to vector<2x512xf32>
    %172 = vector.broadcast %170 : vector<1x512xf32> to vector<2x512xf32>
    %173 = arith.mulf %171, %172 : vector<2x512xf32>
    %174 = arith.addf %168, %173 : vector<2x512xf32>
    %c0_43 = arith.constant 0 : index
    %c13 = arith.constant 13 : index
    %175 = vector.load %arg2[%c0_43, %c13] : memref<2x18xf32, #tpu.memory_space<vmem>>, vector<2x1xf32>
    %176 = vector.extract_strided_slice %52 {offsets = [1, 0], sizes = [1, 512], strides = [1, 1]} : vector<2x512xf32> to vector<1x512xf32>
    %177 = vector.broadcast %175 : vector<2x1xf32> to vector<2x512xf32>
    %178 = vector.broadcast %176 : vector<1x512xf32> to vector<2x512xf32>
    %179 = arith.mulf %177, %178 : vector<2x512xf32>
    %180 = arith.addf %174, %179 : vector<2x512xf32>
    %c511_i32 = arith.constant 511 : i32
    %181 = tpu.dynamic_rotate %52 by %c511_i32 dim 1 : vector<2x512xf32>, i32 -> vector<2x512xf32>
    %c0_i32_44 = arith.constant 0 : i32
    %182 = vector.broadcast %c0_i32_44 : i32 to vector<1x512xi32>
    %183 = arith.cmpi sge, %55, %182 : vector<1x512xi32>
    %c256_i32_45 = arith.constant 256 : i32
    %184 = vector.broadcast %c256_i32_45 : i32 to vector<1x512xi32>
    %185 = arith.cmpi slt, %55, %184 : vector<1x512xi32>
    %186 = arith.andi %183, %185 : vector<1x512xi1>
    %c-1_i32_46 = arith.constant -1 : i32
    %187 = vector.broadcast %c-1_i32_46 : i32 to vector<1x512xi32>
    %188 = arith.cmpi sge, %57, %187 : vector<1x512xi32>
    %189 = arith.andi %186, %188 : vector<1x512xi1>
    %c15_i32_47 = arith.constant 15 : i32
    %190 = vector.broadcast %c15_i32_47 : i32 to vector<1x512xi32>
    %191 = arith.cmpi slt, %57, %190 : vector<1x512xi32>
    %192 = arith.andi %189, %191 : vector<1x512xi1>
    %cst_48 = arith.constant 0.000000e+00 : f32
    %193 = vector.shape_cast %192 : vector<1x512xi1> to vector<1x512xi1>
    %194 = vector.broadcast %193 : vector<1x512xi1> to vector<2x512xi1>
    %195 = vector.broadcast %cst_48 : f32 to vector<2x512xf32>
    %196 = arith.select %194, %181, %195 : vector<2x512xi1>, vector<2x512xf32>
    %c0_49 = arith.constant 0 : index
    %c5_50 = arith.constant 5 : index
    %197 = vector.load %arg2[%c0_49, %c5_50] : memref<2x18xf32, #tpu.memory_space<vmem>>, vector<2x1xf32>
    %198 = vector.extract_strided_slice %196 {offsets = [0, 0], sizes = [1, 512], strides = [1, 1]} : vector<2x512xf32> to vector<1x512xf32>
    %199 = vector.broadcast %197 : vector<2x1xf32> to vector<2x512xf32>
    %200 = vector.broadcast %198 : vector<1x512xf32> to vector<2x512xf32>
    %201 = arith.mulf %199, %200 : vector<2x512xf32>
    %202 = arith.addf %180, %201 : vector<2x512xf32>
    %c0_51 = arith.constant 0 : index
    %c14 = arith.constant 14 : index
    %203 = vector.load %arg2[%c0_51, %c14] : memref<2x18xf32, #tpu.memory_space<vmem>>, vector<2x1xf32>
    %204 = vector.extract_strided_slice %196 {offsets = [1, 0], sizes = [1, 512], strides = [1, 1]} : vector<2x512xf32> to vector<1x512xf32>
    %205 = vector.broadcast %203 : vector<2x1xf32> to vector<2x512xf32>
    %206 = vector.broadcast %204 : vector<1x512xf32> to vector<2x512xf32>
    %207 = arith.mulf %205, %206 : vector<2x512xf32>
    %208 = arith.addf %202, %207 : vector<2x512xf32>
    %c497_i32 = arith.constant 497 : i32
    %209 = tpu.dynamic_rotate %52 by %c497_i32 dim 1 : vector<2x512xf32>, i32 -> vector<2x512xf32>
    %c-16_i32 = arith.constant -16 : i32
    %210 = vector.broadcast %c-16_i32 : i32 to vector<1x512xi32>
    %211 = arith.cmpi sge, %55, %210 : vector<1x512xi32>
    %c240_i32 = arith.constant 240 : i32
    %212 = vector.broadcast %c240_i32 : i32 to vector<1x512xi32>
    %213 = arith.cmpi slt, %55, %212 : vector<1x512xi32>
    %214 = arith.andi %211, %213 : vector<1x512xi1>
    %c1_i32_52 = arith.constant 1 : i32
    %215 = vector.broadcast %c1_i32_52 : i32 to vector<1x512xi32>
    %216 = arith.cmpi sge, %57, %215 : vector<1x512xi32>
    %217 = arith.andi %214, %216 : vector<1x512xi1>
    %c17_i32_53 = arith.constant 17 : i32
    %218 = vector.broadcast %c17_i32_53 : i32 to vector<1x512xi32>
    %219 = arith.cmpi slt, %57, %218 : vector<1x512xi32>
    %220 = arith.andi %217, %219 : vector<1x512xi1>
    %cst_54 = arith.constant 0.000000e+00 : f32
    %221 = vector.shape_cast %220 : vector<1x512xi1> to vector<1x512xi1>
    %222 = vector.broadcast %221 : vector<1x512xi1> to vector<2x512xi1>
    %223 = vector.broadcast %cst_54 : f32 to vector<2x512xf32>
    %224 = arith.select %222, %209, %223 : vector<2x512xi1>, vector<2x512xf32>
    %c0_55 = arith.constant 0 : index
    %c6_56 = arith.constant 6 : index
    %225 = vector.load %arg2[%c0_55, %c6_56] : memref<2x18xf32, #tpu.memory_space<vmem>>, vector<2x1xf32>
    %226 = vector.extract_strided_slice %224 {offsets = [0, 0], sizes = [1, 512], strides = [1, 1]} : vector<2x512xf32> to vector<1x512xf32>
    %227 = vector.broadcast %225 : vector<2x1xf32> to vector<2x512xf32>
    %228 = vector.broadcast %226 : vector<1x512xf32> to vector<2x512xf32>
    %229 = arith.mulf %227, %228 : vector<2x512xf32>
    %230 = arith.addf %208, %229 : vector<2x512xf32>
    %c0_57 = arith.constant 0 : index
    %c15 = arith.constant 15 : index
    %231 = vector.load %arg2[%c0_57, %c15] : memref<2x18xf32, #tpu.memory_space<vmem>>, vector<2x1xf32>
    %232 = vector.extract_strided_slice %224 {offsets = [1, 0], sizes = [1, 512], strides = [1, 1]} : vector<2x512xf32> to vector<1x512xf32>
    %233 = vector.broadcast %231 : vector<2x1xf32> to vector<2x512xf32>
    %234 = vector.broadcast %232 : vector<1x512xf32> to vector<2x512xf32>
    %235 = arith.mulf %233, %234 : vector<2x512xf32>
    %236 = arith.addf %230, %235 : vector<2x512xf32>
    %c496_i32 = arith.constant 496 : i32
    %237 = tpu.dynamic_rotate %52 by %c496_i32 dim 1 : vector<2x512xf32>, i32 -> vector<2x512xf32>
    %c-16_i32_58 = arith.constant -16 : i32
    %238 = vector.broadcast %c-16_i32_58 : i32 to vector<1x512xi32>
    %239 = arith.cmpi sge, %55, %238 : vector<1x512xi32>
    %c240_i32_59 = arith.constant 240 : i32
    %240 = vector.broadcast %c240_i32_59 : i32 to vector<1x512xi32>
    %241 = arith.cmpi slt, %55, %240 : vector<1x512xi32>
    %242 = arith.andi %239, %241 : vector<1x512xi1>
    %c0_i32_60 = arith.constant 0 : i32
    %243 = vector.broadcast %c0_i32_60 : i32 to vector<1x512xi32>
    %244 = arith.cmpi sge, %57, %243 : vector<1x512xi32>
    %245 = arith.andi %242, %244 : vector<1x512xi1>
    %c16_i32_61 = arith.constant 16 : i32
    %246 = vector.broadcast %c16_i32_61 : i32 to vector<1x512xi32>
    %247 = arith.cmpi slt, %57, %246 : vector<1x512xi32>
    %248 = arith.andi %245, %247 : vector<1x512xi1>
    %cst_62 = arith.constant 0.000000e+00 : f32
    %249 = vector.shape_cast %248 : vector<1x512xi1> to vector<1x512xi1>
    %250 = vector.broadcast %249 : vector<1x512xi1> to vector<2x512xi1>
    %251 = vector.broadcast %cst_62 : f32 to vector<2x512xf32>
    %252 = arith.select %250, %237, %251 : vector<2x512xi1>, vector<2x512xf32>
    %c0_63 = arith.constant 0 : index
    %c7_64 = arith.constant 7 : index
    %253 = vector.load %arg2[%c0_63, %c7_64] : memref<2x18xf32, #tpu.memory_space<vmem>>, vector<2x1xf32>
    %254 = vector.extract_strided_slice %252 {offsets = [0, 0], sizes = [1, 512], strides = [1, 1]} : vector<2x512xf32> to vector<1x512xf32>
    %255 = vector.broadcast %253 : vector<2x1xf32> to vector<2x512xf32>
    %256 = vector.broadcast %254 : vector<1x512xf32> to vector<2x512xf32>
    %257 = arith.mulf %255, %256 : vector<2x512xf32>
    %258 = arith.addf %236, %257 : vector<2x512xf32>
    %c0_65 = arith.constant 0 : index
    %c16 = arith.constant 16 : index
    %259 = vector.load %arg2[%c0_65, %c16] : memref<2x18xf32, #tpu.memory_space<vmem>>, vector<2x1xf32>
    %260 = vector.extract_strided_slice %252 {offsets = [1, 0], sizes = [1, 512], strides = [1, 1]} : vector<2x512xf32> to vector<1x512xf32>
    %261 = vector.broadcast %259 : vector<2x1xf32> to vector<2x512xf32>
    %262 = vector.broadcast %260 : vector<1x512xf32> to vector<2x512xf32>
    %263 = arith.mulf %261, %262 : vector<2x512xf32>
    %264 = arith.addf %258, %263 : vector<2x512xf32>
    %c495_i32 = arith.constant 495 : i32
    %265 = tpu.dynamic_rotate %52 by %c495_i32 dim 1 : vector<2x512xf32>, i32 -> vector<2x512xf32>
    %c-16_i32_66 = arith.constant -16 : i32
    %266 = vector.broadcast %c-16_i32_66 : i32 to vector<1x512xi32>
    %267 = arith.cmpi sge, %55, %266 : vector<1x512xi32>
    %c240_i32_67 = arith.constant 240 : i32
    %268 = vector.broadcast %c240_i32_67 : i32 to vector<1x512xi32>
    %269 = arith.cmpi slt, %55, %268 : vector<1x512xi32>
    %270 = arith.andi %267, %269 : vector<1x512xi1>
    %c-1_i32_68 = arith.constant -1 : i32
    %271 = vector.broadcast %c-1_i32_68 : i32 to vector<1x512xi32>
    %272 = arith.cmpi sge, %57, %271 : vector<1x512xi32>
    %273 = arith.andi %270, %272 : vector<1x512xi1>
    %c15_i32_69 = arith.constant 15 : i32
    %274 = vector.broadcast %c15_i32_69 : i32 to vector<1x512xi32>
    %275 = arith.cmpi slt, %57, %274 : vector<1x512xi32>
    %276 = arith.andi %273, %275 : vector<1x512xi1>
    %cst_70 = arith.constant 0.000000e+00 : f32
    %277 = vector.shape_cast %276 : vector<1x512xi1> to vector<1x512xi1>
    %278 = vector.broadcast %277 : vector<1x512xi1> to vector<2x512xi1>
    %279 = vector.broadcast %cst_70 : f32 to vector<2x512xf32>
    %280 = arith.select %278, %265, %279 : vector<2x512xi1>, vector<2x512xf32>
    %c0_71 = arith.constant 0 : index
    %c8 = arith.constant 8 : index
    %281 = vector.load %arg2[%c0_71, %c8] : memref<2x18xf32, #tpu.memory_space<vmem>>, vector<2x1xf32>
    %282 = vector.extract_strided_slice %280 {offsets = [0, 0], sizes = [1, 512], strides = [1, 1]} : vector<2x512xf32> to vector<1x512xf32>
    %283 = vector.broadcast %281 : vector<2x1xf32> to vector<2x512xf32>
    %284 = vector.broadcast %282 : vector<1x512xf32> to vector<2x512xf32>
    %285 = arith.mulf %283, %284 : vector<2x512xf32>
    %286 = arith.addf %264, %285 : vector<2x512xf32>
    %c0_72 = arith.constant 0 : index
    %c17 = arith.constant 17 : index
    %287 = vector.load %arg2[%c0_72, %c17] : memref<2x18xf32, #tpu.memory_space<vmem>>, vector<2x1xf32>
    %288 = vector.extract_strided_slice %280 {offsets = [1, 0], sizes = [1, 512], strides = [1, 1]} : vector<2x512xf32> to vector<1x512xf32>
    %289 = vector.broadcast %287 : vector<2x1xf32> to vector<2x512xf32>
    %290 = vector.broadcast %288 : vector<1x512xf32> to vector<2x512xf32>
    %291 = arith.mulf %289, %290 : vector<2x512xf32>
    %292 = arith.addf %286, %291 : vector<2x512xf32>
    %c0_73 = arith.constant 0 : index
    %c0_74 = arith.constant 0 : index
    %293 = vector.load %arg3[%c0_73, %c0_74] : memref<2x1xf32, #tpu.memory_space<vmem>>, vector<2x1xf32>
    %294 = vector.broadcast %293 : vector<2x1xf32> to vector<2x512xf32>
    %295 = arith.addf %292, %294 : vector<2x512xf32>
    %cst_75 = arith.constant 0.000000e+00 : f32
    %296 = vector.broadcast %cst_75 : f32 to vector<2x512xf32>
    %297 = arith.maximumf %295, %296 : vector<2x512xf32>
    %c0_76 = arith.constant 0 : index
    %c0_77 = arith.constant 0 : index
    %298 = vector.load %arg4[%c0_76, %c0_77] : memref<8x2xf32, #tpu.memory_space<vmem>>, vector<8x1xf32>
    %299 = vector.extract_strided_slice %297 {offsets = [0, 0], sizes = [1, 512], strides = [1, 1]} : vector<2x512xf32> to vector<1x512xf32>
    %300 = vector.broadcast %298 : vector<8x1xf32> to vector<8x512xf32>
    %301 = vector.broadcast %299 : vector<1x512xf32> to vector<8x512xf32>
    %302 = arith.mulf %300, %301 : vector<8x512xf32>
    %c0_78 = arith.constant 0 : index
    %c1_79 = arith.constant 1 : index
    %303 = vector.load %arg4[%c0_78, %c1_79] : memref<8x2xf32, #tpu.memory_space<vmem>>, vector<8x1xf32>
    %304 = vector.extract_strided_slice %297 {offsets = [1, 0], sizes = [1, 512], strides = [1, 1]} : vector<2x512xf32> to vector<1x512xf32>
    %305 = vector.broadcast %303 : vector<8x1xf32> to vector<8x512xf32>
    %306 = vector.broadcast %304 : vector<1x512xf32> to vector<8x512xf32>
    %307 = arith.mulf %305, %306 : vector<8x512xf32>
    %308 = arith.addf %302, %307 : vector<8x512xf32>
    %c0_80 = arith.constant 0 : index
    %c0_81 = arith.constant 0 : index
    %309 = vector.load %arg5[%c0_80, %c0_81] : memref<8x1xf32, #tpu.memory_space<vmem>>, vector<8x1xf32>
    %310 = vector.broadcast %309 : vector<8x1xf32> to vector<8x512xf32>
    %311 = arith.addf %308, %310 : vector<8x512xf32>
    %cst_82 = arith.constant 0.000000e+00 : f32
    %312 = vector.broadcast %cst_82 : f32 to vector<8x512xf32>
    %313 = arith.maximumf %311, %312 : vector<8x512xf32>
    %314 = arith.addf %313, %0 : vector<8x512xf32>
    %cst_83 = arith.constant 0.000000e+00 : f32
    %315 = vector.broadcast %cst_83 : f32 to vector<8x512xf32>
    %316 = arith.maximumf %314, %315 : vector<8x512xf32>
    %c0_84 = arith.constant 0 : index
    %c0_85 = arith.constant 0 : index
    %317 = vector.load %arg7[%c0_84, %c0_85] : memref<8x512xf32, #tpu.memory_space<vmem>>, vector<8x512xf32>
    tpu.vector_store %arg7[%c0_84, %c0_85], %316 {strides = array<i32>} : memref<8x512xf32, #tpu.memory_space<vmem>>, vector<8x512xf32>,
    return
  }
}

</mosaic_0001>

<bundles_post_ra>
// kernel: tpu_custom_call.1
= control target key start
LH: loop header
LB: loop body
LE: loop exit
PB: predicated region body
PF: predicated region fallthrough
CT: control target
= control target key end

     0   :  { %12 = vsyncpa [#allocation3], 0  ;;  %s1545_s0 = inlined_call_operand.vmem [shape: f32[2,8], index: 0, kind: input, shape index: {}]   ;;  %s1546_s1 = inlined_call_operand.vmem [shape: f32[2,1], index: 1, kind: input, shape index: {}]   ;;  %s1547_s2 = inlined_call_operand.vmem [shape: f32[2,18], index: 2, kind: input, shape index: {}]   ;;  %s1548_s3 = inlined_call_operand.vmem [shape: f32[2,1], index: 3, kind: input, shape index: {}]   ;;  %s1549_s4 = inlined_call_operand.vmem [shape: f32[8,2], index: 4, kind: input, shape index: {}]   ;;  %s1550_s5 = inlined_call_operand.vmem [shape: f32[8,1], index: 5, kind: input, shape index: {}]   ;;  %s1551_s6 = inlined_call_operand.hbm [shape: f32[8,512], index: 6, kind: input, shape index: {}]   ;;  %s1552_s7 = inlined_call_operand.hbm [shape: f32[8,512], index: 7, kind: output, shape index: {}]  }
   0x1   :  { %13 = vsyncpa [#allocation4], 0  ;;  %s31_s26 = sshll.u32 %s1551_s6, 4  ;;  %s1007_s27 = smov [#allocation2]   ;;  %s32_s26 = int_to_ptr.hbm [resolvable:$true] %s31_s26 }
   0x2   :  { %s33_s28 = sshll.u32 %s1007_s27, 4  ;;  %s34_s28 = int_to_ptr.vmem [resolvable:$true] %s33_s28 }
   0x3   :  { %36 = dma.hbm_to_vmem [thread:$0]  %s32_s26, 512, %s34_s28, [#allocation3]  }
   0x4   :  { %1003 = dma.done.wait [#allocation3], 512  }
   0x5   :  { %1004 = vsyncadd [#allocation3], 4294966784  ;;  %v1008_v0 = vmov 2   ;;  %v1009_v1 = vmov 0   ;;  %v45_v2 = vld [vmem:[%s1545_s0] sm:$0x3] }
   0x6   :  { %924 = vset.pattern.permute.xlu1 %v1008_v0  ;;  %923 = vset.pattern.permute.xlu0 %v1009_v1  ;;  %v171_v3 = vld [vmem:[%s1546_s1] sm:$0x3]  ;;  %v1010_v4 = vmov 4   ;;  %v1011_v5 = vmov 3   ;;  %v1012_v7 = vmov 5   ;;  %v1013_v8 = vmov 6  }
   0x7   :  { %76 = vperm.xlu1 %924, %v45_v2   ;;  %48 = vperm.xlu0 %923, %v45_v2   ;;  %v1088_v6 = vld [vmem:[%s1547_s2] sm:$0x3]  ;;  %v1014_v9 = vmov 7   ;;  %v1015_v10 = vmov 1   ;;  %v1016_v11 = vmov 9   ;;  %v1017_v12 = vmov 10  }
   0x8   :  { %926 = vset.pattern.permute.xlu2 %v1010_v4  ;;  %v1018_v13 = vmov 13   ;;  %v1019_v14 = vmov 11   ;;  %v1020_v15 = vmov 12   ;;  %v1021_v16 = vmov 14   ;;  %v1107_v22 = vld [vmem:[#allocation2] sm:$0xff]  ;;  %v1109_v23 = vld [vmem:[#allocation2 + $0x8] sm:$0xff] }
   0x9   :  { %108 = vperm.xlu2 %926, %v45_v2   ;;  %v1022_v18 = vmov 15   ;;  %v1111_v24 = vld [vmem:[#allocation2 + $0x10] sm:$0xff]  ;;  %v1113_v25 = vld [vmem:[#allocation2 + $0x18] sm:$0xff]  ;;  %v111_v27 = vperm.slane %v1107_v22, 4  ;;  %v112_v28 = vperm.slane %v1109_v23, 4  ;;  %v51_v30 = vperm.slane %v1107_v22, 0 }
   0xa   :  { %v113_v29 = vperm.slane %v1111_v24, 4  ;;  %v52_v31 = vperm.slane %v1109_v23, 0  ;;  %v53_v32 = vperm.slane %v1111_v24, 0  ;;  %v54_v33 = vperm.slane %v1113_v25, 0  ;;  %s1023_s0 = smov 16   ;;  %s1024_s1 = smov 17  }
   0xb   :  { %v79_v34 = vperm.slane %v1107_v22, 2  ;;  %v80_v35 = vperm.slane %v1109_v23, 2  ;;  %v81_v36 = vperm.slane %v1111_v24, 2  ;;  %v114_v37 = vperm.slane %v1113_v25, 4  ;;  %s1025_s2 = smov 15   ;;  %s1026_s11 = smov 1  }
   0xc   :  { %v82_v38 = vperm.slane %v1113_v25, 2  ;;  %v95_v39 = vperm.slane %v1107_v22, 3  ;;  %v96_v40 = vperm.slane %v1109_v23, 3  ;;  %v97_v41 = vperm.slane %v1111_v24, 3  ;;  %s1027_s12 = smov 127   ;;  %s1028_s13 = smov 113  }
   0xd   :  { %v98_v42 = vperm.slane %v1113_v25, 3  ;;  %v63_v47 = vperm.slane %v1107_v22, 1  ;;  %v64_v48 = vperm.slane %v1109_v23, 1  ;;  %v65_v49 = vperm.slane %v1111_v24, 1  ;;  %s1030_s14 = smov 112   ;;  %s1032_s15 = smov 111  }
   0xe   :  { %v66_v50 = vperm.slane %v1113_v25, 1  ;;  %v143_v53 = vperm.slane %v1107_v22, 6  ;;  %v144_v54 = vperm.slane %v1109_v23, 6  ;;  %v145_v55 = vperm.slane %v1111_v24, 6  ;;  %s885_s23 = sshll.u32 %s1552_s7, 4  ;;  %s886_s23 = int_to_ptr.hbm [resolvable:$true] %s885_s23 }
   0xf   :  { %925 = vset.pattern.permute.xlu1 %v1011_v5  ;;  %174 = vperm.xlu0 %923, %v171_v3   ;;  %v146_v56 = vperm.slane %v1113_v25, 6  ;;  %v127_v57 = vperm.slane %v1107_v22, 5  ;;  %v128_v58 = vperm.slane %v1109_v23, 5  ;;  %v130_v59 = vperm.slane %v1113_v25, 5 }
  0x10   :  { %92 = vperm.xlu1 %925, %v45_v2  }
  0x11   :  { %927 = vset.pattern.permute.xlu2 %v1012_v7 }
  0x12   :  { %124 = vperm.xlu2 %927, %v45_v2  }
  0x17   :  { %254 = vperm.xlu0 %923, %v1088_v6  }
  0x18   :  { %928 = vset.pattern.permute.xlu1 %v1013_v8 }
  0x19   :  { %140 = vperm.xlu1 %928, %v45_v2  }
  0x1a   :  { %929 = vset.pattern.permute.xlu2 %v1014_v9 }
  0x1b   :  { %156 = vperm.xlu2 %929, %v45_v2  }
  0x1f   :  { %930 = vset.pattern.permute.xlu0 %v1015_v10 }
  0x20   :  { %60 = vperm.xlu0 %930, %v45_v2  }
  0x21   :  { %931 = vset.pattern.permute.xlu1 %v1016_v11 }
  0x22   :  { %266 = vperm.xlu1 %931, %v1088_v6  }
  0x23   :  { %934 = vset.pattern.permute.xlu2 %v1019_v14 }
  0x24   :  { %412 = vperm.xlu2 %934, %v1088_v6  }
  0x28   :  { %323 = vperm.xlu0 %930, %v1088_v6  }
  0x2a   :  { %932 = vset.pattern.permute.xlu1 %v1017_v12 }
  0x2b   :  { %339 = vperm.xlu1 %932, %v1088_v6  }
  0x2c   :  { %936 = vset.pattern.permute.xlu2 %v1020_v15 }
  0x2d   :  { %489 = vperm.xlu2 %936, %v1088_v6  }
  0x30   :  { %937 = vset.pattern.permute.xlu0 %v1010_v4 }
  0x31   :  { %505 = vperm.xlu0 %937, %v1088_v6  }
  0x33   :  { %933 = vset.pattern.permute.xlu1 %v1008_v0 }
  0x34   :  { %396 = vperm.xlu1 %933, %v1088_v6  }
  0x35   :  { %940 = vset.pattern.permute.xlu2 %v1021_v16 }
  0x36   :  { %586 = vperm.xlu2 %940, %v1088_v6  }
  0x3c   :  { %935 = vset.pattern.permute.xlu1 %v1011_v5 }
  0x3d   :  { %473 = vperm.xlu1 %935, %v1088_v6  }
  0x3e   :  { %942 = vset.pattern.permute.xlu2 %v1022_v18 }
  0x3f   :  { %663 = vperm.xlu2 %942, %v1088_v6  }
  0x45   :  { %938 = vset.pattern.permute.xlu1 %v1018_v13 }
  0x46   :  { %521 = vperm.xlu1 %938, %v1088_v6  }
  0x4e   :  { %939 = vset.pattern.permute.xlu1 %v1012_v7 }
  0x4f   :  { %570 = vperm.xlu1 %939, %v1088_v6  }
  0x57   :  { %941 = vset.pattern.permute.xlu1 %v1013_v8 }
  0x58   :  { %647 = vperm.xlu1 %941, %v1088_v6  }
  0x60   :  { %943 = vset.pattern.permute.xlu1 %v1014_v9 }
  0x63   :  { %v109_v21 = vpop.permute.xlu2 %108 }
  0x64   :  { %v115_v43 = vmul.f32 %v111_v27, %v109_v21  ;;  %v116_v44 = vmul.f32 %v112_v28, %v109_v21  ;;  %v117_v45 = vmul.f32 %v113_v29, %v109_v21  ;;  %v118_v52 = vmul.f32 %v114_v37, %v109_v21 }
  0x6c   :  { %v125_v51 = vpop.permute.xlu2 %124 }
  0x79   :  { %v49_v17 = vpop.permute.xlu0 %48  ;;  %v77_v20 = vpop.permute.xlu1 %76 }
  0x7a   :  { %v55_v60 = vmul.f32 %v51_v30, %v49_v17  ;;  %v56_v61 = vmul.f32 %v52_v31, %v49_v17  ;;  %v57_v62 = vmul.f32 %v53_v32, %v49_v17  ;;  %v58_v63 = vmul.f32 %v54_v33, %v49_v17 }
  0x7b   :  { %v83_v7 = vmul.f32 %v79_v34, %v77_v20  ;;  %v84_v8 = vmul.f32 %v80_v35, %v77_v20  ;;  %v85_v9 = vmul.f32 %v81_v36, %v77_v20  ;;  %v86_v11 = vmul.f32 %v82_v38, %v77_v20 }
  0x7c   :  { %v129_v31 = vperm.slane %v1111_v24, 5  ;;  %v131_v32 = vmul.f32 %v127_v57, %v125_v51  ;;  %v159_v33 = vperm.slane %v1107_v22, 7  ;;  %v160_v34 = vperm.slane %v1109_v23, 7 }
  0x7d   :  { %v162_v57 = vperm.slane %v1113_v25, 7 }
  0x81   :  { %v1105_v19 = vpop.permute.xlu0 %174 }
  0x82   :  { %v93_v46 = vpop.permute.xlu1 %92 }
  0x83   :  { %v99_v16 = vmul.f32 %v95_v39, %v93_v46  ;;  %v100_v18 = vmul.f32 %v96_v40, %v93_v46  ;;  %v101_v21 = vmul.f32 %v97_v41, %v93_v46  ;;  %v102_v27 = vmul.f32 %v98_v42, %v93_v46  ;;  %v157_v39 = vpop.permute.xlu2 %156 }
  0x84   :  { %v132_v42 = vmul.f32 %v128_v58, %v125_v51  ;;  %v134_v46 = vmul.f32 %v130_v59, %v125_v51  ;;  %v163_v22 = vmul.f32 %v159_v33, %v157_v39 }
  0x89   :  { %v1115_v26 = vpop.permute.xlu0 %254 }
  0x8b   :  { %v141_v20 = vpop.permute.xlu1 %140 }
  0x8c   :  { %v147_v40 = vmul.f32 %v143_v53, %v141_v20  ;;  %v148_v41 = vmul.f32 %v144_v54, %v141_v20  ;;  %v150_v23 = vmul.f32 %v146_v56, %v141_v20  ;;  %v161_v53 = vperm.slane %v1111_v24, 7 }
  0x92   :  { %v61_v0 = vpop.permute.xlu0 %60 }
  0x93   :  { %v67_v2 = vmul.f32 %v63_v47, %v61_v0  ;;  %v68_v3 = vmul.f32 %v64_v48, %v61_v0  ;;  %v69_v4 = vmul.f32 %v65_v49, %v61_v0  ;;  %v70_v5 = vmul.f32 %v66_v50, %v61_v0 }
  0x95   :  { %v71_v12 = vadd.f32 %v67_v2, %v55_v60  ;;  %v72_v13 = vadd.f32 %v68_v3, %v56_v61  ;;  %v73_v14 = vadd.f32 %v69_v4, %v57_v62  ;;  %v74_v15 = vadd.f32 %v70_v5, %v58_v63 }
  0x96   :  { %v133_v60 = vmul.f32 %v129_v31, %v125_v51  ;;  %v164_v61 = vmul.f32 %v160_v34, %v157_v39  ;;  %v149_v2 = vmul.f32 %v145_v55, %v141_v20  ;;  %v165_v51 = vmul.f32 %v161_v53, %v157_v39  ;;  %v808_v31 = vld [vmem:[%s1548_s3] sm:$0x3]  ;;  %s1034_s3 = smov [#allocation5]  }
  0x97   :  { %v87_v28 = vadd.f32 %v83_v7, %v71_v12  ;;  %v88_v29 = vadd.f32 %v84_v8, %v72_v13  ;;  %v89_v17 = vadd.f32 %v85_v9, %v73_v14  ;;  %v90_v30 = vadd.f32 %v86_v11, %v74_v15  ;;  %v1179_v12 = vpop.permute.xlu1 %266  ;;  %v1184_v13 = vpop.permute.xlu2 %412  ;;  %v852_v34 = vld [vmem:[%s1550_s5] sm:$0xff]  ;;  %s883_s5 = sshll.u32 %s1034_s3, 4  ;;  %s884_s5 = int_to_ptr.vmem [resolvable:$true] %s883_s5 }
  0x99   :  { %v103_v35 = vadd.f32 %v99_v16, %v87_v28  ;;  %v104_v36 = vadd.f32 %v100_v18, %v88_v29  ;;  %v105_v37 = vadd.f32 %v101_v21, %v89_v17  ;;  %v106_v38 = vadd.f32 %v102_v27, %v90_v30  ;;  %v822_v17 = vld [vmem:[%s1549_s4] sm:$0xff] }
  0x9a   :  { %v1031_v18 = vmov 17   ;;  %v1033_v27 = vmov 8   ;;  %v1230_v20 = vpop.permute.xlu0 %323 }
  0x9b   :  { %v119_v47 = vadd.f32 %v115_v43, %v103_v35  ;;  %v120_v48 = vadd.f32 %v116_v44, %v104_v36  ;;  %v121_v49 = vadd.f32 %v117_v45, %v105_v37  ;;  %v122_v50 = vadd.f32 %v118_v52, %v106_v38  ;;  %946 = vset.pattern.permute.xlu2 %v1031_v18 }
  0x9c   :  { %v166_v43 = vmul.f32 %v162_v57, %v157_v39  ;;  %v185_v35 = vlaneseq }
  0x9d   :  { %v135_v62 = vadd.f32 %v131_v32, %v119_v47  ;;  %v136_v63 = vadd.f32 %v132_v42, %v120_v48  ;;  %v138_v0 = vadd.f32 %v134_v46, %v122_v50  ;;  %v137_v3 = vadd.f32 %v133_v60, %v121_v49 }
  0x9e   :  { %v1233_v36 = vand.u32 127, %v185_v35 }
  0x9f   :  { %v151_v54 = vadd.f32 %v147_v40, %v135_v62  ;;  %v152_v58 = vadd.f32 %v148_v41, %v136_v63  ;;  %v154_v59 = vadd.f32 %v150_v23, %v138_v0  ;;  %v153_v52 = vadd.f32 %v149_v2, %v137_v3  ;;  %v1188_v14 = vpop.permute.xlu1 %339  ;;  %v1191_v15 = vpop.permute.xlu2 %489 }
  0xa0   :  { %v190_v40 = vand.u32 255, %v1233_v36  ;;  %v194_v41 = vand.u32 15, %v1233_v36  ;;  %v1240_v42 = vadd.s32 128, %v1233_v36  ;;  %vm206_vm2 = vcmp.lt.s32.totalorder %v1233_v36, 17 }
  0xa1   :  { %v167_v44 = vadd.f32 %v163_v22, %v151_v54  ;;  %v168_v45 = vadd.f32 %v164_v61, %v152_v58  ;;  %v170_v56 = vadd.f32 %v166_v43, %v154_v59  ;;  %v169_v55 = vadd.f32 %v165_v51, %v153_v52 }
  0xa2   :  { %vm1242_vm0 = vcmp.ge.s32.totalorder %v190_v40, 16  ;;  %vm1246_vm1 = vcmp.ge.s32.totalorder %v194_v41, 1  ;;  %v195_v50 = vand.u32 15, %v1240_v42  ;;  %vm289_vm4 = vcmp.lt.s32.totalorder %v1233_v36, 16 }
  0xa3   :  { %v177_v25 = vadd.f32 %v1105_v19, %v167_v44  ;;  %v178_v4 = vadd.f32 %v1105_v19, %v168_v45  ;;  %v180_v24 = vadd.f32 %v1105_v19, %v170_v56  ;;  %v179_v8 = vadd.f32 %v1105_v19, %v169_v55  ;;  %v506_v38 = vpop.permute.xlu0 %505  ;;  %vm227_vm3 = vmand %vm1242_vm0, %vm1246_vm1 }
  0xa4   :  { %v1029_v19 = vmov 16   ;;  %vm1276_vm5 = vcmp.ge.s32.totalorder %v195_v50, 1  ;;  %vm362_vm8 = vcmp.lt.s32.totalorder %v1233_v36, 15  ;;  %vm1312_vm9 = vcmp.lt.s32.totalorder %v194_v41, 15 }
  0xa5   :  { %v1151_v5 = vmax.f32 %v177_v25, 0.0  ;;  %v1153_v7 = vmax.f32 %v178_v4, 0.0  ;;  %v1160_v9 = vmax.f32 %v180_v24, 0.0  ;;  %v1162_v11 = vmax.f32 %v179_v8, 0.0  ;;  %944 = vset.pattern.permute.xlu0 %v1029_v19  ;;  %vm379_vm13 = vmand %vm1242_vm0, %vm1312_vm9 }
  0xa6   :  { %vm435_vm14 = vcmp.lt.s32.totalorder %v1233_v36, 1 }
  0xa7   :  { %283 = vrot.lane.b32.xlu0 %v1153_v7, %s1023_s0  ;;  %200 = vrot.lane.b32.xlu2 %v1153_v7, %s1024_s1  ;;  %v1196_v16 = vpop.permute.xlu1 %396  ;;  %v1198_v21 = vpop.permute.xlu2 %586  ;;  %v508_v22 = vperm.slane %v1151_v5, 0  ;;  %v509_v62 = vperm.slane %v1153_v7, 0  ;;  %v510_v3 = vperm.slane %v1162_v11, 0  ;;  %v511_v53 = vperm.slane %v1160_v9, 0 }
  0xa8   :  { %198 = vrot.lane.b32.xlu1 %v1151_v5, %s1024_s1  ;;  %v524_v58 = vperm.slane %v1151_v5, 1 }
  0xa9   :  { %v1301_v4 = vmul.f32 %v508_v22, %v506_v38  ;;  %v1303_v56 = vmul.f32 %v509_v62, %v506_v38  ;;  %v1329_v41 = vmul.f32 %v510_v3, %v506_v38 }
  0xaf   :  { %360 = vrot.lane.b32.xlu0 %v1160_v9, %s1025_s2  ;;  %204 = vrot.lane.b32.xlu2 %v1160_v9, %s1024_s1  ;;  %v1203_v28 = vpop.permute.xlu1 %473  ;;  %v1207_v29 = vpop.permute.xlu2 %663 }
  0xb0   :  { %202 = vrot.lane.b32.xlu1 %v1162_v11, %s1024_s1  ;;  %1554 = vst [vmem:[#allocation8_spill] sm:$0xff] %v1207_v29 }
  0xb7   :  { %427 = vrot.lane.b32.xlu0 %v1151_v5, %s1026_s11  ;;  %281 = vrot.lane.b32.xlu2 %v1151_v5, %s1023_s0 }
  0xb8   :  { %285 = vrot.lane.b32.xlu1 %v1162_v11, %s1023_s0  ;;  %v1213_v30 = vpop.permute.xlu1 %521 }
  0xb9   :  { %v1336_v22 = vmul.f32 %v524_v58, %v1213_v30 }
  0xbf   :  { %433 = vrot.lane.b32.xlu0 %v1160_v9, %s1026_s11  ;;  %287 = vrot.lane.b32.xlu2 %v1160_v9, %s1023_s0 }
  0xc0   :  { %356 = vrot.lane.b32.xlu1 %v1153_v7, %s1025_s2 }
  0xc1   :  { %v1223_v33 = vpop.permute.xlu1 %570 }
  0xc7   :  { %542 = vrot.lane.b32.xlu0 %v1160_v9, %s1027_s12  ;;  %354 = vrot.lane.b32.xlu2 %v1151_v5, %s1025_s2 }
  0xc8   :  { %429 = vrot.lane.b32.xlu1 %v1153_v7, %s1026_s11 }
  0xca   :  { %v1235_v37 = vpop.permute.xlu1 %647 }
  0xcf   :  { %601 = vrot.lane.b32.xlu0 %v1151_v5, %s1028_s13  ;;  %358 = vrot.lane.b32.xlu2 %v1162_v11, %s1025_s2 }
  0xd0   :  { %538 = vrot.lane.b32.xlu1 %v1153_v7, %s1027_s12 }
  0xd7   :  { %607 = vrot.lane.b32.xlu0 %v1160_v9, %s1028_s13  ;;  %431 = vrot.lane.b32.xlu2 %v1162_v11, %s1026_s11 }
  0xd8   :  { %603 = vrot.lane.b32.xlu1 %v1153_v7, %s1028_s13 }
  0xdf   :  { %678 = vrot.lane.b32.xlu0 %v1151_v5, %s1030_s14  ;;  %536 = vrot.lane.b32.xlu2 %v1151_v5, %s1027_s12 }
  0xe0   :  { %680 = vrot.lane.b32.xlu1 %v1153_v7, %s1030_s14 }
  0xe7   :  { %684 = vrot.lane.b32.xlu0 %v1160_v9, %s1030_s14  ;;  %540 = vrot.lane.b32.xlu2 %v1162_v11, %s1027_s12 }
  0xe8   :  { %712 = vperm.xlu1 %943, %v1088_v6  }
  0xef   :  { %745 = vrot.lane.b32.xlu0 %v1153_v7, %s1032_s15  ;;  %605 = vrot.lane.b32.xlu2 %v1162_v11, %s1028_s13 }
  0xf0   :  { %747 = vrot.lane.b32.xlu1 %v1162_v11, %s1032_s15 }
  0xf1   :  { %945 = vset.pattern.permute.xlu1 %v1033_v27 }
  0xf7   :  { %728 = vperm.xlu0 %944, %v1088_v6   ;;  %682 = vrot.lane.b32.xlu2 %v1162_v11, %s1030_s14 }
  0xf8   :  { %777 = vperm.xlu1 %945, %v1088_v6  }
  0xff   :  { %743 = vrot.lane.b32.xlu2 %v1151_v5, %s1032_s15  ;;  %949 = vset.pattern.permute.xlu0 %v1015_v10 }
 0x100   :  { %947 = vset.pattern.permute.xlu1 %v1009_v1  ;;  %837 = vperm.xlu0 %949, %v822_v17  }
 0x101   :  { %811 = vperm.xlu1 %947, %v808_v31   ;;  %v1221_v32 = vpop.permute.xlu2 %200 }
 0x107   :  { %749 = vrot.lane.b32.xlu2 %v1160_v9, %s1032_s15 }
 0x108   :  { %950 = vset.pattern.permute.xlu0 %v1009_v1 }
 0x109   :  { %855 = vperm.xlu1 %947, %v852_v34   ;;  %v205_v10 = vpop.permute.xlu2 %204 }
 0x10f   :  { %793 = vperm.xlu2 %946, %v1088_v6   ;;  %v1252_v6 = vadd.s32 256, %v1233_v36 }
 0x111   :  { %v282_v39 = vpop.permute.xlu2 %281  ;;  %v192_v57 = vand.u32 255, %v1252_v6  ;;  %v196_v23 = vand.u32 15, %v1252_v6  ;;  %v1331_v6 = vmul.f32 %v511_v53, %v506_v38 }
 0x113   :  { %vm1291_vm6 = vcmp.ge.s32.totalorder %v192_v57, 16  ;;  %vm1297_vm7 = vcmp.ge.s32.totalorder %v196_v23, 1  ;;  %vm1357_vm15 = vcmp.lt.s32.totalorder %v196_v23, 15 }
 0x114   :  { %vm229_vm11 = vmand %vm1291_vm6, %vm1297_vm7 }
 0x117   :  { %948 = vset.pattern.permute.xlu2 %v1009_v1  ;;  %v1265_v1 = vadd.s32 384, %v1233_v36 }
 0x118   :  { %825 = vperm.xlu2 %948, %v822_v17  }
 0x119   :  { %v1254_v48 = vpop.permute.xlu0 %283  ;;  %v1256_v49 = vpop.permute.xlu2 %287  ;;  %v197_v54 = vand.u32 15, %v1265_v1 }
 0x11a   :  { %v199_v60 = vpop.permute.xlu1 %198  ;;  %v293_v43 = vsel %vm289_vm4, %v1256_v49, %v282_v39 }
 0x11b   :  { %v210_v61 = vsel %vm206_vm2, %v205_v10, %v199_v60  ;;  %v209_v0 = vsel %vm206_vm2, %v199_v60, %v1221_v32  ;;  %v318_v19 = vsel %vm1242_vm0, %v293_v43, 0.0  ;;  %vm1316_vm10 = vcmp.ge.s32.totalorder %v197_v54, 1 }
 0x11c   :  { %v247_v2 = vsel %vm227_vm3, %v210_v61, 0.0  ;;  %v248_v45 = vsel %vm1276_vm5, %v209_v0, 0.0  ;;  %v292_v61 = vsel %vm289_vm4, %v282_v39, %v1254_v48  ;;  %vm1343_vm12 = vcmp.lt.s32.totalorder %v197_v54, 15 }
 0x11d   :  { %v257_v52 = vperm.slane %v247_v2, 0  ;;  %v269_v51 = vperm.slane %v247_v2, 1  ;;  %v258_v31 = vperm.slane %v248_v45, 0  ;;  %v270_v34 = vperm.slane %v248_v45, 1 }
 0x11e   :  { %v326_v38 = vperm.slane %v318_v19, 0  ;;  %v327_v54 = vperm.slane %v292_v61, 0  ;;  %v343_v58 = vperm.slane %v292_v61, 1  ;;  %v342_v46 = vperm.slane %v318_v19, 1 }
 0x11f   :  { %v261_v60 = vmul.f32 %v257_v52, %v1115_v26  ;;  %v273_v57 = vmul.f32 %v269_v51, %v1179_v12  ;;  %v262_v39 = vmul.f32 %v258_v31, %v1115_v26  ;;  %v274_v3 = vmul.f32 %v270_v34, %v1179_v12 }
 0x120   :  { %v330_v31 = vmul.f32 %v326_v38, %v1230_v20  ;;  %vm1383_vm0 = vcmp.lt.s32.totalorder %v195_v50, 15  ;;  %vm544_vm3 = vcmp.lt.s32.totalorder %v1233_v36, 127 }
 0x121   :  { %v361_v24 = vpop.permute.xlu0 %360  ;;  %v1307_v8 = vpop.permute.xlu2 %354  ;;  %v277_v43 = vadd.f32 %v273_v57, %v261_v60  ;;  %v278_v57 = vadd.f32 %v274_v3, %v262_v39 }
 0x122   :  { %v203_v17 = vpop.permute.xlu1 %202  ;;  %v366_v62 = vsel %vm362_vm8, %v361_v24, %v1307_v8 }
 0x123   :  { %v207_v35 = vsel %vm206_vm2, %v203_v17, %v205_v10  ;;  %v208_v40 = vsel %vm206_vm2, %v1221_v32, %v203_v17  ;;  %v391_v52 = vsel %vm379_vm13, %v366_v62, 0.0  ;;  %v334_v62 = vadd.f32 %v330_v31, %v277_v43  ;;  %vm381_vm2 = vmand %vm1291_vm6, %vm1357_vm15 }
 0x124   :  { %v250_v10 = vsel %vm1316_vm10, %v207_v35, 0.0  ;;  %v249_v0 = vsel %vm229_vm11, %v208_v40, 0.0  ;;  %v331_v43 = vmul.f32 %v327_v54, %v1230_v20  ;;  %v347_v31 = vmul.f32 %v343_v58, %v1188_v14 }
 0x125   :  { %v260_v2 = vperm.slane %v250_v10, 0  ;;  %v272_v53 = vperm.slane %v250_v10, 1  ;;  %v259_v51 = vperm.slane %v249_v0, 0  ;;  %v271_v17 = vperm.slane %v249_v0, 1 }
 0x126   :  { %v399_v0 = vperm.slane %v391_v52, 0 }
 0x127   :  { %v264_v34 = vmul.f32 %v260_v2, %v1115_v26  ;;  %v276_v10 = vmul.f32 %v272_v53, %v1179_v12  ;;  %v275_v39 = vmul.f32 %v271_v17, %v1179_v12 }
 0x128   :  { %v403_v12 = vmul.f32 %v399_v0, %v1196_v16 }
 0x129   :  { %v1361_v35 = vpop.permute.xlu0 %427  ;;  %v359_v40 = vpop.permute.xlu2 %358  ;;  %v280_v5 = vadd.f32 %v276_v10, %v264_v34 }
 0x12a   :  { %v363_v60 = vsel %vm362_vm8, %v359_v40, %v361_v24  ;;  %v286_v23 = vpop.permute.xlu1 %285  ;;  %v263_v24 = vmul.f32 %v259_v51, %v1115_v26  ;;  %v346_v26 = vmul.f32 %v342_v46, %v1188_v14  ;;  %v415_v51 = vperm.slane %v391_v52, 1 }
 0x12b   :  { %v394_v19 = vsel %vm1343_vm12, %v363_v60, 0.0  ;;  %v290_v61 = vsel %vm289_vm4, %v286_v23, %v1256_v49  ;;  %v291_v38 = vsel %vm289_vm4, %v1254_v48, %v286_v23  ;;  %v335_v23 = vadd.f32 %v331_v43, %v278_v57 }
 0x12c   :  { %v320_v2 = vsel %vm1291_vm6, %v291_v38, 0.0  ;;  %v329_v53 = vperm.slane %v290_v61, 0  ;;  %v345_v60 = vperm.slane %v290_v61, 1  ;;  %v402_v55 = vperm.slane %v394_v19, 0 }
 0x12d   :  { %v328_v3 = vperm.slane %v320_v2, 0  ;;  %v418_v17 = vperm.slane %v394_v19, 1  ;;  %v350_v61 = vadd.f32 %v346_v26, %v334_v62  ;;  %v279_v38 = vadd.f32 %v275_v39, %v263_v24 }
 0x12e   :  { %v333_v49 = vmul.f32 %v329_v53, %v1230_v20  ;;  %v349_v10 = vmul.f32 %v345_v60, %v1188_v14  ;;  %v406_v54 = vmul.f32 %v402_v55, %v1196_v16  ;;  %v344_v52 = vperm.slane %v320_v2, 1 }
 0x12f   :  { %v332_v50 = vmul.f32 %v328_v3, %v1230_v20  ;;  %v407_v19 = vadd.f32 %v403_v12, %v350_v61  ;;  %v422_v62 = vmul.f32 %v418_v17, %v1184_v13  ;;  %v419_v60 = vmul.f32 %v415_v51, %v1184_v13 }
 0x130   :  { %v337_v34 = vadd.f32 %v333_v49, %v280_v5  ;;  %vm609_vm6 = vcmp.lt.s32.totalorder %v1233_v36, 113 }
 0x131   :  { %v434_v53 = vpop.permute.xlu0 %433  ;;  %v432_v59 = vpop.permute.xlu2 %431  ;;  %v336_v39 = vadd.f32 %v332_v50, %v279_v38  ;;  %v423_v17 = vadd.f32 %v419_v60, %v407_v19 }
 0x132   :  { %v353_v29 = vadd.f32 %v349_v10, %v337_v34  ;;  %v439_v58 = vsel %vm435_vm14, %v434_v53, %v1361_v35  ;;  %v436_v46 = vsel %vm435_vm14, %v432_v59, %v434_v53  ;;  %v357_v5 = vpop.permute.xlu1 %356  ;;  %v351_v10 = vadd.f32 %v347_v31, %v335_v23 }
 0x133   :  { %v468_v20 = vsel %vm1246_vm1, %v439_v58, 0.0  ;;  %v471_v55 = vsel %vm1316_vm10, %v436_v46, 0.0  ;;  %v364_v57 = vsel %vm362_vm8, %v357_v5, %v359_v40  ;;  %v365_v44 = vsel %vm362_vm8, %v1307_v8, %v357_v5 }
 0x134   :  { %v410_v0 = vadd.f32 %v406_v54, %v353_v29  ;;  %v479_v24 = vperm.slane %v471_v55, 0  ;;  %v476_v3 = vperm.slane %v468_v20, 0  ;;  %v393_v2 = vsel %vm381_vm2, %v364_v57, 0.0 }
 0x135   :  { %v495_v26 = vperm.slane %v471_v55, 1  ;;  %v348_v40 = vmul.f32 %v344_v52, %v1188_v14  ;;  %v392_v12 = vsel %vm1383_vm0, %v365_v44, 0.0  ;;  %v401_v29 = vperm.slane %v393_v2, 0 }
 0x136   :  { %v426_v49 = vadd.f32 %v422_v62, %v410_v0  ;;  %v483_v43 = vmul.f32 %v479_v24, %v1203_v28  ;;  %v400_v61 = vperm.slane %v392_v12, 0  ;;  %v480_v38 = vmul.f32 %v476_v3, %v1203_v28 }
 0x137   :  { %v352_v8 = vadd.f32 %v348_v40, %v336_v39  ;;  %v405_v51 = vmul.f32 %v401_v29, %v1196_v16  ;;  %v193_v54 = vand.u32 255, %v1265_v1  ;;  %v492_v14 = vperm.slane %v468_v20, 1 }
 0x138   :  { %v487_v34 = vadd.f32 %v483_v43, %v426_v49  ;;  %v499_v58 = vmul.f32 %v495_v26, %v1191_v15  ;;  %v404_v46 = vmul.f32 %v400_v61, %v1196_v16  ;;  %v416_v5 = vperm.slane %v392_v12, 1 }
 0x139   :  { %v543_v50 = vpop.permute.xlu0 %542  ;;  %v537_v53 = vpop.permute.xlu2 %536  ;;  %v417_v55 = vperm.slane %v393_v2, 1  ;;  %v1575_v1 = vperm.slane %v1153_v7, 1  ;;  %v1576_v16 = vperm.slane %v1160_v9, 1  ;;  %v484_v24 = vadd.f32 %v480_v38, %v423_v17 }
 0x13a   :  { %v430_v52 = vpop.permute.xlu1 %429  ;;  %v548_v31 = vsel %vm544_vm3, %v543_v50, %v537_v53  ;;  %v503_v62 = vadd.f32 %v499_v58, %v487_v34  ;;  %v408_v0 = vadd.f32 %v404_v46, %v351_v10  ;;  %v409_v39 = vadd.f32 %v405_v51, %v352_v8 }
 0x13b   :  { %v437_v23 = vsel %vm435_vm14, %v430_v52, %v432_v59  ;;  %v438_v57 = vsel %vm435_vm14, %v1361_v35, %v430_v52  ;;  %v529_v20 = vmul.f32 %v1575_v1, %v1213_v30  ;;  %v531_v19 = vmul.f32 %v1576_v16, %v1213_v30 }
 0x13c   :  { %v469_v3 = vsel %vm1276_vm5, %v438_v57, 0.0  ;;  %vm1439_vm4 = vcmp.lt.s32.totalorder %v193_v54, 240  ;;  %v191_v35 = vand.u32 255, %v1240_v42  ;;  %v420_v7 = vmul.f32 %v416_v5, %v1184_v13 }
 0x13d   :  { %v568_v44 = vsel %vm1343_vm12, %v548_v31, 0.0  ;;  %v470_v9 = vsel %vm1297_vm7, %v437_v23, 0.0  ;;  %v477_v2 = vperm.slane %v469_v3, 0  ;;  %v496_v60 = vmul.f32 %v492_v14, %v1191_v15  ;;  %vm629_vm8 = vmand %vm1439_vm4, %vm1316_vm10 }
 0x13e   :  { %v421_v49 = vmul.f32 %v417_v55, %v1184_v13  ;;  %v478_v43 = vperm.slane %v470_v9, 0  ;;  %v493_v26 = vperm.slane %v469_v3, 1  ;;  %v519_v40 = vadd.f32 %v1331_v6, %v503_v62 }
 0x13f   :  { %v424_v12 = vadd.f32 %v420_v7, %v408_v0  ;;  %v481_v42 = vmul.f32 %v477_v2, %v1203_v28  ;;  %v494_v29 = vperm.slane %v470_v9, 1  ;;  %v500_v17 = vadd.f32 %v496_v60, %v484_v24 }
 0x140   :  { %v425_v34 = vadd.f32 %v421_v49, %v409_v39  ;;  %v576_v10 = vperm.slane %v568_v44, 0  ;;  %v482_v61 = vmul.f32 %v478_v43, %v1203_v28  ;;  %v592_v51 = vperm.slane %v568_v44, 1 }
 0x141   :  { %v602_v8 = vpop.permute.xlu0 %601  ;;  %v541_v38 = vpop.permute.xlu2 %540  ;;  %v485_v54 = vadd.f32 %v481_v42, %v424_v12  ;;  %v497_v14 = vmul.f32 %v493_v26, %v1191_v15  ;;  %v498_v46 = vmul.f32 %v494_v29, %v1191_v15  ;;  %v535_v28 = vadd.f32 %v531_v19, %v519_v40 }
 0x142   :  { %v545_v13 = vsel %vm544_vm3, %v541_v38, %v543_v50  ;;  %v539_v58 = vpop.permute.xlu1 %538  ;;  %v486_v6 = vadd.f32 %v482_v61, %v425_v34  ;;  %v580_v57 = vmul.f32 %v576_v10, %v1223_v33  ;;  %v1579_v16 = vperm.slane %v1162_v11, 1 }
 0x143   :  { %v567_v5 = vsel %vm1357_vm15, %v545_v13, 0.0  ;;  %v546_v52 = vsel %vm544_vm3, %v539_v58, %v541_v38  ;;  %v501_v55 = vadd.f32 %v497_v14, %v485_v54  ;;  %v547_v23 = vsel %vm544_vm3, %v537_v53, %v539_v58 }
 0x144   :  { %v575_v31 = vperm.slane %v567_v5, 0  ;;  %v502_v1 = vadd.f32 %v498_v46, %v486_v6  ;;  %v565_v50 = vsel %vm1312_vm9, %v547_v23, 0.0  ;;  %v566_v15 = vsel %vm1383_vm0, %v546_v52, 0.0 }
 0x145   :  { %v530_v62 = vmul.f32 %v1579_v16, %v1213_v30  ;;  %v516_v19 = vadd.f32 %v1301_v4, %v500_v17  ;;  %v517_v0 = vadd.f32 %v1303_v56, %v501_v55  ;;  %v573_v24 = vperm.slane %v565_v50, 0 }
 0x146   :  { %v518_v53 = vadd.f32 %v1329_v41, %v502_v1  ;;  %v579_v39 = vmul.f32 %v575_v31, %v1223_v33  ;;  %v574_v3 = vperm.slane %v566_v15, 0  ;;  %v596_v7 = vmul.f32 %v592_v51, %v1198_v21 }
 0x147   :  { %v591_v44 = vperm.slane %v567_v5, 1  ;;  %v533_v9 = vadd.f32 %v529_v20, %v517_v0  ;;  %vm1482_vm11 = vcmp.lt.s32.totalorder %v191_v35, 240  ;;  %v584_v30 = vadd.f32 %v580_v57, %v535_v28 }
 0x148   :  { %v534_v4 = vadd.f32 %v530_v62, %v518_v53  ;;  %v577_v56 = vmul.f32 %v573_v24, %v1223_v33  ;;  %v578_v41 = vmul.f32 %v574_v3, %v1223_v33  ;;  %v532_v49 = vadd.f32 %v1336_v22, %v516_v19  ;;  %vm627_vm10 = vmand %vm1482_vm11, %vm1276_vm5 }
 0x149   :  { %v608_v2 = vpop.permute.xlu0 %607  ;;  %v606_v60 = vpop.permute.xlu2 %605  ;;  %v589_v20 = vperm.slane %v565_v50, 1  ;;  %v590_v40 = vperm.slane %v566_v15, 1  ;;  %v595_v33 = vmul.f32 %v591_v44, %v1198_v21  ;;  %v600_v22 = vadd.f32 %v596_v7, %v584_v30  ;;  %vm761_vm13 = vmand %vm1482_vm11, %vm1383_vm0 }
 0x14a   :  { %v613_v27 = vsel %vm609_vm6, %v608_v2, %v602_v8  ;;  %v610_v35 = vsel %vm609_vm6, %v606_v60, %v608_v2  ;;  %v604_v43 = vpop.permute.xlu1 %603  ;;  %v583_v26 = vadd.f32 %v579_v39, %v534_v4  ;;  %v581_v34 = vadd.f32 %v577_v56, %v532_v49 }
 0x14b   :  { %v645_v12 = vsel %vm629_vm8, %v613_v27, 0.0  ;;  %v644_v42 = vsel %vm1297_vm7, %v610_v35, 0.0  ;;  %v582_v10 = vadd.f32 %v578_v41, %v533_v9  ;;  %v611_v61 = vsel %vm609_vm6, %v604_v43, %v606_v60  ;;  %v1582_v60 = vld [vmem:[#allocation8_spill] sm:$0xff]  ;;  %vm763_vm7 = vmand %vm1439_vm4, %vm1343_vm12 }
 0x14c   :  { %v653_v29 = vperm.slane %v645_v12, 0  ;;  %v652_v17 = vperm.slane %v644_v42, 0  ;;  %v599_v38 = vadd.f32 %v595_v33, %v583_v26  ;;  %v612_v54 = vsel %vm609_vm6, %v602_v8, %v604_v43 }
 0x14d   :  { %v593_v14 = vmul.f32 %v589_v20, %v1198_v21  ;;  %v594_v63 = vmul.f32 %v590_v40, %v1198_v21  ;;  %v642_v13 = vsel %vm1246_vm1, %v612_v54, 0.0  ;;  %v643_v58 = vsel %vm627_vm10, %v611_v61, 0.0 }
 0x14e   :  { %v657_v51 = vmul.f32 %v653_v29, %v1235_v37  ;;  %v656_v25 = vmul.f32 %v652_v17, %v1235_v37  ;;  %v650_v5 = vperm.slane %v642_v13, 0  ;;  %v651_v52 = vperm.slane %v643_v58, 0 }
 0x14f   :  { %v597_v31 = vadd.f32 %v593_v14, %v581_v34  ;;  %v598_v23 = vadd.f32 %v594_v63, %v582_v10  ;;  %vm686_vm5 = vcmp.lt.s32.totalorder %v1233_v36, 112  ;;  %v669_v0 = vperm.slane %v645_v12, 1 }
 0x150   :  { %v661_v6 = vadd.f32 %v657_v51, %v600_v22  ;;  %v660_v46 = vadd.f32 %v656_v25, %v599_v38  ;;  %v654_v57 = vmul.f32 %v650_v5, %v1235_v37  ;;  %v655_v8 = vmul.f32 %v651_v52, %v1235_v37 }
 0x151   :  { %v679_v28 = vpop.permute.xlu0 %678  ;;  %v683_v55 = vpop.permute.xlu2 %682  ;;  %v668_v24 = vperm.slane %v644_v42, 1  ;;  %v666_v3 = vperm.slane %v642_v13, 1  ;;  %v667_v7 = vperm.slane %v643_v58, 1  ;;  %vm751_vm1 = vcmp.lt.s32.totalorder %v1233_v36, 111 }
 0x152   :  { %v681_v1 = vpop.permute.xlu1 %680  ;;  %v658_v50 = vadd.f32 %v654_v57, %v597_v31  ;;  %v659_v15 = vadd.f32 %v655_v8, %v598_v23  ;;  %v673_v49 = vmul.f32 %v669_v0, %v1582_v60 }
 0x153   :  { %v688_v19 = vsel %vm686_vm5, %v681_v1, %v683_v55  ;;  %v689_v44 = vsel %vm686_vm5, %v679_v28, %v681_v1  ;;  %v672_v20 = vmul.f32 %v668_v24, %v1582_v60  ;;  %v670_v27 = vmul.f32 %v666_v3, %v1582_v60 }
 0x154   :  { %v708_v37 = vsel %vm1482_vm11, %v688_v19, 0.0  ;;  %v715_v4 = vperm.slane %v689_v44, 0  ;;  %v671_v35 = vmul.f32 %v667_v7, %v1582_v60  ;;  %v677_v33 = vadd.f32 %v673_v49, %v661_v6 }
 0x155   :  { %v716_v56 = vperm.slane %v708_v37, 0  ;;  %v676_v29 = vadd.f32 %v672_v20, %v660_v46  ;;  %v674_v34 = vadd.f32 %v670_v27, %v658_v50  ;;  %v731_v61 = vperm.slane %v689_v44, 1 }
 0x156   :  { %v675_v10 = vadd.f32 %v671_v35, %v659_v15  ;;  %v732_v38 = vperm.slane %v708_v37, 1 }
 0x159   :  { %v685_v21 = vpop.permute.xlu0 %684  ;;  %v744_v47 = vpop.permute.xlu2 %743 }
 0x15a   :  { %v690_v16 = vsel %vm686_vm5, %v685_v21, %v679_v28  ;;  %v713_v62 = vpop.permute.xlu1 %712  ;;  %v687_v53 = vsel %vm686_vm5, %v683_v55, %v685_v21 }
 0x15b   :  { %v710_v39 = vsel %vm1439_vm4, %v690_v16, 0.0  ;;  %v717_v9 = vperm.slane %v687_v53, 0  ;;  %v719_v26 = vmul.f32 %v715_v4, %v713_v62  ;;  %v720_v40 = vmul.f32 %v716_v56, %v713_v62 }
 0x15c   :  { %v718_v30 = vperm.slane %v710_v39, 0  ;;  %v733_v54 = vperm.slane %v687_v53, 1  ;;  %v734_v14 = vperm.slane %v710_v39, 1 }
 0x15d   :  { %v721_v17 = vmul.f32 %v717_v9, %v713_v62  ;;  %v723_v63 = vadd.f32 %v719_v26, %v674_v34  ;;  %v724_v13 = vadd.f32 %v720_v40, %v675_v10 }
 0x15e   :  { %v722_v22 = vmul.f32 %v718_v30, %v713_v62 }
 0x15f   :  { %v725_v48 = vadd.f32 %v721_v17, %v676_v29 }
 0x160   :  { %v726_v58 = vadd.f32 %v722_v22, %v677_v33 }
 0x161   :  { %v746_v41 = vpop.permute.xlu0 %745  ;;  %v750_v2 = vpop.permute.xlu2 %749 }
 0x162   :  { %v748_v43 = vpop.permute.xlu1 %747  ;;  %v754_v12 = vsel %vm751_vm1, %v744_v47, %v746_v41  ;;  %v755_v42 = vsel %vm751_vm1, %v750_v2, %v744_v47 }
 0x163   :  { %v752_v32 = vsel %vm751_vm1, %v748_v43, %v750_v2  ;;  %v753_v59 = vsel %vm751_vm1, %v746_v41, %v748_v43  ;;  %v772_v51 = vsel %vm1312_vm9, %v754_v12, 0.0  ;;  %v775_v25 = vsel %vm763_vm7, %v755_v42, 0.0 }
 0x164   :  { %v773_v11 = vsel %vm761_vm13, %v753_v59, 0.0  ;;  %v774_v6 = vsel %vm1357_vm15, %v752_v32, 0.0  ;;  %v780_v46 = vperm.slane %v772_v51, 0  ;;  %v796_v5 = vperm.slane %v772_v51, 1 }
 0x165   :  { %v783_v36 = vperm.slane %v775_v25, 0  ;;  %v799_v52 = vperm.slane %v775_v25, 1  ;;  %v781_v8 = vperm.slane %v773_v11, 0  ;;  %v782_v1 = vperm.slane %v774_v6, 0 }
 0x166   :  { %v797_v50 = vperm.slane %v773_v11, 1  ;;  %v798_v15 = vperm.slane %v774_v6, 1 }
 0x169   :  { %v729_v28 = vpop.permute.xlu0 %728  ;;  %v794_v21 = vpop.permute.xlu2 %793 }
 0x16a   :  { %v735_v55 = vmul.f32 %v731_v61, %v729_v28  ;;  %v736_v31 = vmul.f32 %v732_v38, %v729_v28  ;;  %v737_v18 = vmul.f32 %v733_v54, %v729_v28  ;;  %v738_v23 = vmul.f32 %v734_v14, %v729_v28  ;;  %v778_v57 = vpop.permute.xlu1 %777 }
 0x16b   :  { %v784_v19 = vmul.f32 %v780_v46, %v778_v57  ;;  %v785_v0 = vmul.f32 %v781_v8, %v778_v57  ;;  %v786_v24 = vmul.f32 %v782_v1, %v778_v57  ;;  %v787_v53 = vmul.f32 %v783_v36, %v778_v57  ;;  %v951_v1 = vld [vmem:[#allocation2] sm:$0xff] }
 0x16c   :  { %v739_v47 = vadd.f32 %v735_v55, %v723_v63  ;;  %v740_v16 = vadd.f32 %v736_v31, %v724_v13  ;;  %v741_v62 = vadd.f32 %v737_v18, %v725_v48  ;;  %v742_v45 = vadd.f32 %v738_v23, %v726_v58 }
 0x16d   :  { %v800_v39 = vmul.f32 %v796_v5, %v794_v21  ;;  %v801_v3 = vmul.f32 %v797_v50, %v794_v21  ;;  %v802_v7 = vmul.f32 %v798_v15, %v794_v21  ;;  %v803_v44 = vmul.f32 %v799_v52, %v794_v21  ;;  %v952_v15 = vld [vmem:[#allocation2 + $0x8] sm:$0xff] }
 0x16e   :  { %v788_v37 = vadd.f32 %v784_v19, %v739_v47  ;;  %v789_v9 = vadd.f32 %v785_v0, %v740_v16  ;;  %v790_v30 = vadd.f32 %v786_v24, %v741_v62  ;;  %v791_v4 = vadd.f32 %v787_v53, %v742_v45  ;;  %v953_v47 = vld [vmem:[#allocation2 + $0x10] sm:$0xff]  ;;  %v954_v62 = vld [vmem:[#allocation2 + $0x18] sm:$0xff] }
 0x170   :  { %v805_v56 = vadd.f32 %v801_v3, %v789_v9  ;;  %v806_v41 = vadd.f32 %v802_v7, %v790_v30  ;;  %v807_v2 = vadd.f32 %v803_v44, %v791_v4  ;;  %v804_v60 = vadd.f32 %v800_v39, %v788_v37 }
 0x172   :  { %v838_v33 = vpop.permute.xlu0 %837  ;;  %v826_v10 = vpop.permute.xlu2 %825 }
 0x173   :  { %v812_v49 = vpop.permute.xlu1 %811 }
 0x174   :  { %v814_v20 = vadd.f32 %v812_v49, %v804_v60  ;;  %v815_v27 = vadd.f32 %v812_v49, %v805_v56  ;;  %v816_v35 = vadd.f32 %v812_v49, %v806_v41  ;;  %v817_v43 = vadd.f32 %v812_v49, %v807_v2 }
 0x176   :  { %v818_v26 = vmax.f32 %v814_v20, 0.0  ;;  %v819_v40 = vmax.f32 %v815_v27, 0.0  ;;  %v820_v12 = vmax.f32 %v816_v35, 0.0  ;;  %v821_v42 = vmax.f32 %v817_v43, 0.0 }
 0x178   :  { %v840_v29 = vperm.slane %v818_v26, 1  ;;  %v841_v17 = vperm.slane %v819_v40, 1  ;;  %v842_v22 = vperm.slane %v820_v12, 1  ;;  %v843_v34 = vperm.slane %v821_v42, 1 }
 0x179   :  { %v828_v32 = vperm.slane %v818_v26, 0  ;;  %v829_v59 = vperm.slane %v819_v40, 0  ;;  %v830_v61 = vperm.slane %v820_v12, 0  ;;  %v831_v38 = vperm.slane %v821_v42, 0 }
 0x17a   :  { %v844_v51 = vmul.f32 %v840_v29, %v838_v33  ;;  %v845_v25 = vmul.f32 %v841_v17, %v838_v33  ;;  %v846_v54 = vmul.f32 %v842_v22, %v838_v33  ;;  %v847_v14 = vmul.f32 %v843_v34, %v838_v33 }
 0x17b   :  { %v832_v63 = vmul.f32 %v828_v32, %v826_v10  ;;  %v833_v13 = vmul.f32 %v829_v59, %v826_v10  ;;  %v834_v48 = vmul.f32 %v830_v61, %v826_v10  ;;  %v835_v58 = vmul.f32 %v831_v38, %v826_v10  ;;  %v856_v36 = vpop.permute.xlu1 %855 }
 0x17d   :  { %v849_v11 = vadd.f32 %v845_v25, %v833_v13  ;;  %v850_v6 = vadd.f32 %v846_v54, %v834_v48  ;;  %v851_v46 = vadd.f32 %v847_v14, %v835_v58  ;;  %v848_v5 = vadd.f32 %v844_v51, %v832_v63 }
 0x17f   :  { %v858_v52 = vadd.f32 %v856_v36, %v848_v5  ;;  %v859_v28 = vadd.f32 %v856_v36, %v849_v11  ;;  %v860_v55 = vadd.f32 %v856_v36, %v850_v6  ;;  %v861_v31 = vadd.f32 %v856_v36, %v851_v46 }
 0x181   :  { %v862_v18 = vmax.f32 %v858_v52, 0.0  ;;  %v863_v23 = vmax.f32 %v859_v28, 0.0  ;;  %v864_v57 = vmax.f32 %v860_v55, 0.0  ;;  %v865_v8 = vmax.f32 %v861_v31, 0.0 }
 0x183   :  { %v866_v50 = vadd.f32 %v951_v1, %v862_v18  ;;  %v867_v21 = vadd.f32 %v952_v15, %v863_v23  ;;  %v868_v16 = vadd.f32 %v953_v47, %v864_v57  ;;  %v869_v45 = vadd.f32 %v954_v62, %v865_v8 }
 0x185   :  { %v870_v19 = vmax.f32 %v866_v50, 0.0  ;;  %v871_v0 = vmax.f32 %v867_v21, 0.0  ;;  %v872_v24 = vmax.f32 %v868_v16, 0.0  ;;  %v873_v53 = vmax.f32 %v869_v45, 0.0 }
 0x187   :  { %874 = vst [vmem:[#allocation5] sm:$0xff] %v870_v19 }
 0x188   :  { %875 = vst [vmem:[#allocation5 + $0x8] sm:$0xff] %v871_v0 }
 0x189   :  { %876 = vst [vmem:[#allocation5 + $0x10] sm:$0xff] %v872_v24 }
 0x18a   :  { %877 = vst [vmem:[#allocation5 + $0x18] sm:$0xff] %v873_v53 }
 0x18b   :  { %888 = dma.vmem_to_hbm [thread:$0]  %s884_s5, 512, %s886_s23, [#allocation4]  }
 0x18c   :  { %1005 = dma.done.wait [#allocation4], 512  }
 0x18d   :  { %1006 = vsyncadd [#allocation4], 4294966784 }
 0x18e   :  { %893 = vsyncpa [#allocation3], 1 }
 0x18f   :  { %894 = vsyncpa [#allocation4], 1 }

</bundles_post_ra>
